<compile_context>
chip_gen: v5e
topology: v5e:2x2
jax: 0.10.0
libtpu: 0.0.40
codegen_flags: <defaults>
</compile_context>

<pallas_src>
import math
import functools

import jax
import jax.numpy as jnp
from jax.experimental import pallas as pl
from jax.experimental.pallas import tpu as pltpu

_VMEM_LIMIT = 48 * 1024 * 1024  # fits v7x (64 MiB) and v5e/v6e (128 MiB)


# ----------------------------------------------------------------------------
# Helpers
# ----------------------------------------------------------------------------

def _ln(x, g, b, eps=1e-5):
    """f32 LayerNorm over the last axis. g/b are (1, D)."""
    mu = jnp.mean(x, axis=-1, keepdims=True)
    var = jnp.mean(jnp.square(x - mu), axis=-1, keepdims=True)
    return (x - mu) * jax.lax.rsqrt(var + eps) * g + b


def _gelu_exact(x):
    return 0.5 * x * (1.0 + jax.lax.erf(x * 0.7071067811865476))


def _row_tile(m, cap=512):
    """Largest multiple-of-8 row tile dividing m (<= cap), preferring >=2 grid
    steps so both TensorCores get work and the DMA pipeline has room."""
    start = min(cap, m) - (min(cap, m) % 8)
    for t in range(start, 7, -8):
        if m % t == 0 and m // t >= 2:
            return t
    return m


def _k_tile(h):
    """Hidden-dim (4C) tile for the FFN K-grid axis."""
    for t in (512, 256, 128):
        if h % t == 0 and h // t >= 2:
            return t
    return h


def _col_tile(v):
    """Lane-dense vocab tile (MXU-friendly multiples of 128/256)."""
    for t in (512, 256, 128):
        if v % t == 0:
            return t
    # TODO(synk): pad vocab to a multiple of 256 instead of full-width fallback.
    return v


# ----------------------------------------------------------------------------
# Pallas kernels
# ----------------------------------------------------------------------------

def _mla_block_kernel(x_ref, ln1g_ref, ln1b_ref,
                      wdq_ref, qg_ref, qb_ref, wuq_ref,
                      wdkv_ref, kvg_ref, kvb_ref, wuk_ref, wuv_ref,
                      wo_ref, o_ref, y_scratch, *, n_head):
    """Whole MLA attention sub-layer for one batch element, residual fused."""
    x = x_ref[0].astype(jnp.float32)                       # (T, C) f32
    T, C = x.shape
    hs = C // n_head
    scale = 1.0 / math.sqrt(hs)

    xn1 = _ln(x, ln1g_ref[...], ln1b_ref[...]).astype(jnp.bfloat16)

    # Query path: down-proj -> LN -> up-proj.  Fold the 1/sqrt(hs) attention
    # scale into q here (one (T, C) multiply instead of per-head (T, T)).
    cq = jnp.dot(xn1, wdq_ref[...], preferred_element_type=jnp.float32)
    cqn = _ln(cq, qg_ref[...], qb_ref[...]).astype(jnp.bfloat16)
    q = (jnp.dot(cqn, wuq_ref[...], preferred_element_type=jnp.float32)
         * scale).astype(jnp.bfloat16)

    # KV path: shared down-proj -> LN -> separate K / V up-proj.
    # Cast to bf16 once; per-head slices below are views.
    ckv = jnp.dot(xn1, wdkv_ref[...], preferred_element_type=jnp.float32)
    ckvn = _ln(ckv, kvg_ref[...], kvb_ref[...]).astype(jnp.bfloat16)
    k = jnp.dot(ckvn, wuk_ref[...],
                preferred_element_type=jnp.float32).astype(jnp.bfloat16)
    v = jnp.dot(ckvn, wuv_ref[...],
                preferred_element_type=jnp.float32).astype(jnp.bfloat16)

    # Causal mask, hoisted and shared by all heads.  Scores stay in f32
    # (the -1e30 additive mask overflows if scores are ever cast to bf16).
    row = jax.lax.broadcasted_iota(jnp.int32, (T, T), 0)
    col = jax.lax.broadcasted_iota(jnp.int32, (T, T), 1)
    mask_add = jnp.where(col <= row, 0.0, jnp.float32(-1e30))

    # Each head's output goes straight into the (T, C) scratch at its lane
    # offset -- no concat.  Static slices -> zero-cost ref views.
    # TODO(synk): at real sizes (T>=2048, n_head>=16) switch to a fori_loop /
    # head grid axis plus flash-style KV tiling (online softmax) so (T,T)
    # scores and the mask never materialize fully in VMEM.
    for h in range(n_head):
        sl = slice(h * hs, (h + 1) * hs)
        qh, kh, vh = q[:, sl], k[:, sl], v[:, sl]
        # q @ k^T without materializing a transpose: contract last dims.
        s = jax.lax.dot_general(qh, kh, (((1,), (1,)), ((), ())),
                                preferred_element_type=jnp.float32)
        s = s + mask_add
        m = jnp.max(s, axis=-1, keepdims=True)
        p = jnp.exp(s - m)
        denom = jnp.sum(p, axis=-1, keepdims=True)
        p = p * pl.reciprocal(denom, approx=True)
        y_scratch[:, sl] = jnp.dot(p.astype(jnp.bfloat16), vh,
                                   preferred_element_type=jnp.float32
                                   ).astype(jnp.bfloat16)

    attn = jnp.dot(y_scratch[...], wo_ref[...],
                   preferred_element_type=jnp.float32)
    o_ref[0] = (x + attn).astype(o_ref.dtype)


def _ffn_block_kernel(x_ref, g_ref, b_ref, w1_ref, b1_ref, w2_ref, b2_ref,
                      o_ref, xn_scratch, acc_scratch):
    """ln2 -> Linear -> exact GELU -> Linear -> residual, K-tiled over 4C."""
    k = pl.program_id(1)

    @pl.when(k == 0)
    def _():
        x = x_ref[...].astype(jnp.float32)
        xn_scratch[...] = _ln(x, g_ref[...], b_ref[...]).astype(jnp.bfloat16)
        acc_scratch[...] = jnp.zeros_like(acc_scratch)

    h = jnp.dot(xn_scratch[...], w1_ref[...],
                preferred_element_type=jnp.float32) + b1_ref[...]
    h = _gelu_exact(h)
    acc_scratch[...] += jnp.dot(h.astype(jnp.bfloat16), w2_ref[...],
                                preferred_element_type=jnp.float32)

    @pl.when(k == pl.num_programs(1) - 1)
    def _():
        x = x_ref[...].astype(jnp.float32)
        o_ref[...] = (x + acc_scratch[...] + b2_ref[...]).astype(o_ref.dtype)


def _final_head_kernel(x_ref, g_ref, b_ref, wf_ref, bf_ref, o_ref, xn_scratch):
    """Final LayerNorm (computed once per row tile) fused with the vocab
    projection, (M, N) tiled."""
    @pl.when(pl.program_id(1) == 0)
    def _():
        x = x_ref[...].astype(jnp.float32)
        xn_scratch[...] = _ln(x, g_ref[...], b_ref[...]).astype(jnp.bfloat16)

    y = jnp.dot(xn_scratch[...], wf_ref[...],
                preferred_element_type=jnp.float32) + bf_ref[...]
    o_ref[...] = y.astype(o_ref.dtype)


# ----------------------------------------------------------------------------
# pallas_call wrappers
# ----------------------------------------------------------------------------

def mla_attention_block(x, blk, n_head):
    B, T, C = x.shape
    Dq = blk["W_dq"].shape[1]
    Dkv = blk["W_dkv"].shape[1]

    def wspec(shape):
        return pl.BlockSpec(shape, lambda b: (0, 0))

    kernel = functools.partial(_mla_block_kernel, n_head=n_head)
    # TODO(synk): prefetch next layer's weights via a cross-call DMA future so
    # weight streaming overlaps the previous layer's compute (decode shapes).
    return pl.pallas_call(
        kernel,
        out_shape=jax.ShapeDtypeStruct((B, T, C), jnp.bfloat16),
        grid=(B,),
        in_specs=[
            pl.BlockSpec((1, T, C), lambda b: (b, 0, 0)),
            wspec((1, C)), wspec((1, C)),
            wspec((C, Dq)), wspec((1, Dq)), wspec((1, Dq)), wspec((Dq, C)),
            wspec((C, Dkv)), wspec((1, Dkv)), wspec((1, Dkv)),
            wspec((Dkv, C)), wspec((Dkv, C)),
            wspec((C, C)),
        ],
        out_specs=pl.BlockSpec((1, T, C), lambda b: (b, 0, 0)),
        scratch_shapes=[pltpu.VMEM((T, C), jnp.bfloat16)],
        compiler_params=pltpu.CompilerParams(
            dimension_semantics=("parallel",),
            vmem_limit_bytes=_VMEM_LIMIT),
    )(x,
      blk["ln1_g"].reshape(1, C), blk["ln1_b"].reshape(1, C),
      blk["W_dq"], blk["qln_g"].reshape(1, Dq), blk["qln_b"].reshape(1, Dq),
      blk["W_uq"],
      blk["W_dkv"], blk["kvln_g"].reshape(1, Dkv), blk["kvln_b"].reshape(1, Dkv),
      blk["W_uk"], blk["W_uv"], blk["W_o"])


def ffn_block(x, blk):
    B, T, C = x.shape
    M = B * T
    H = blk["W_ff1"].shape[1]
    tm = _row_tile(M)
    th = _k_tile(H)
    x2 = x.reshape(M, C)
    out = pl.pallas_call(
        _ffn_block_kernel,
        out_shape=jax.ShapeDtypeStruct((M, C), jnp.bfloat16),
        grid=(M // tm, H // th),
        in_specs=[
            pl.BlockSpec((tm, C), lambda i, k: (i, 0)),
            pl.BlockSpec((1, C), lambda i, k: (0, 0)),
            pl.BlockSpec((1, C), lambda i, k: (0, 0)),
            pl.BlockSpec((C, th), lambda i, k: (0, k)),
            pl.BlockSpec((1, th), lambda i, k: (0, k)),
            pl.BlockSpec((th, C), lambda i, k: (k, 0)),
            pl.BlockSpec((1, C), lambda i, k: (0, 0)),
        ],
        out_specs=pl.BlockSpec((tm, C), lambda i, k: (i, 0)),
        scratch_shapes=[pltpu.VMEM((tm, C), jnp.bfloat16),
                        pltpu.VMEM((tm, C), jnp.float32)],
        compiler_params=pltpu.CompilerParams(
            dimension_semantics=("parallel", "arbitrary"),
            vmem_limit_bytes=_VMEM_LIMIT),
    )(x2, blk["ln2_g"].reshape(1, C), blk["ln2_b"].reshape(1, C),
      blk["W_ff1"], blk["b_ff1"].reshape(1, H),
      blk["W_ff2"], blk["b_ff2"].reshape(1, C))
    return out.reshape(B, T, C)


def final_head(x, params):
    B, T, C = x.shape
    M = B * T
    V = params["W_f"].shape[1]
    tm = _row_tile(M)
    tn = _col_tile(V)
    x2 = x.reshape(M, C)
    cost = pl.CostEstimate(
        flops=2 * M * C * V,
        transcendentals=0,
        bytes_accessed=M * C * 2 + C * V * 2 + V * 4 + M * V * 4,
    )
    logits = pl.pallas_call(
        _final_head_kernel,
        out_shape=jax.ShapeDtypeStruct((M, V), jnp.float32),
        grid=(M // tm, V // tn),
        in_specs=[
            pl.BlockSpec((tm, C), lambda i, j: (i, 0)),
            pl.BlockSpec((1, C), lambda i, j: (0, 0)),
            pl.BlockSpec((1, C), lambda i, j: (0, 0)),
            pl.BlockSpec((C, tn), lambda i, j: (0, j)),
            pl.BlockSpec((1, tn), lambda i, j: (0, j)),
        ],
        out_specs=pl.BlockSpec((tm, tn), lambda i, j: (i, j)),
        scratch_shapes=[pltpu.VMEM((tm, C), jnp.bfloat16)],
        compiler_params=pltpu.CompilerParams(
            # vocab axis is "arbitrary" so the @pl.when(j == 0) LN cache is
            # valid under megacore splitting of the row axis.
            dimension_semantics=("parallel", "arbitrary"),
            vmem_limit_bytes=_VMEM_LIMIT),
        cost_estimate=cost,
    )(x2, params["ln_f_g"].reshape(1, C), params["ln_f_b"].reshape(1, C),
      params["W_f"], params["b_f"].reshape(1, V))
    return logits.reshape(B, T, V)


# ----------------------------------------------------------------------------
# Parameter init (weights stored transposed (in, out) and bf16 for the MXU;
# LN params / biases / embeddings stay f32)
# ----------------------------------------------------------------------------

def init_params(key, vocab_size, n_embd, block_size, n_layer, q_dim, kv_dim):
    n_keys = 2 + n_layer * 8 + 1
    keys = iter(jax.random.split(key, n_keys))

    def nrm(shape, dtype=jnp.float32):
        return (0.02 * jax.random.normal(next(keys), shape,
                                         dtype=jnp.float32)).astype(dtype)

    ones = lambda n: jnp.ones((n,), jnp.float32)
    zeros = lambda n: jnp.zeros((n,), jnp.float32)
    bf16 = jnp.bfloat16

    params = {
        "tok_emb": nrm((vocab_size, n_embd)),
        "pos_emb": nrm((block_size, n_embd)),
        "blocks": [],
        "ln_f_g": ones(n_embd), "ln_f_b": zeros(n_embd),
    }
    for _ in range(n_layer):
        blk = {
            "ln1_g": ones(n_embd), "ln1_b": zeros(n_embd),
            "W_dq": nrm((n_embd, q_dim), bf16),
            "qln_g": ones(q_dim), "qln_b": zeros(q_dim),
            "W_uq": nrm((q_dim, n_embd), bf16),
            "W_dkv": nrm((n_embd, kv_dim), bf16),
            "kvln_g": ones(kv_dim), "kvln_b": zeros(kv_dim),
            "W_uk": nrm((kv_dim, n_embd), bf16),
            "W_uv": nrm((kv_dim, n_embd), bf16),
            "W_o": nrm((n_embd, n_embd), bf16),
            "ln2_g": ones(n_embd), "ln2_b": zeros(n_embd),
            "W_ff1": nrm((n_embd, 4 * n_embd), bf16), "b_ff1": zeros(4 * n_embd),
            "W_ff2": nrm((4 * n_embd, n_embd), bf16), "b_ff2": zeros(n_embd),
        }
        params["blocks"].append(blk)
    params["W_f"] = nrm((n_embd, vocab_size), bf16)
    params["b_f"] = zeros(vocab_size)
    return params


# ----------------------------------------------------------------------------
# Forward pass (embedding gather is JAX glue; everything else is Pallas)
# ----------------------------------------------------------------------------

def gpt_forward(params, tokens, n_head):
    B, T = tokens.shape
    # Embedding lookup (gather) + positional add stay in plain JAX.
    x = params["tok_emb"][tokens] + params["pos_emb"][:T][None, :, :]
    x = x.astype(jnp.bfloat16)                    # bf16 residual stream

    for blk in params["blocks"]:
        x = mla_attention_block(x, blk, n_head)   # fused ln1+MLA+W_o+residual
        x = ffn_block(x, blk)                     # fused ln2+FFN(K-tiled)+residual

    return final_head(x, params)                  # fused final LN + vocab proj
    # TODO(synk): cross-entropy loss (targets != None) and the generate /
    # advanced_generation sampling loops are host-side glue, not kernel work.


# ----------------------------------------------------------------------------
# Main
# ----------------------------------------------------------------------------

if __name__ == "__main__":
    vocab_size = 1024          # multiple of 256 -> lane-dense vocab tiles
    n_embd = 64
    n_head = 4
    block_size = 16
    n_layer = 2
    q_compression_dim = 32
    kv_compression_dim = 32
    B, T = 2, 16

    key = jax.random.PRNGKey(0)
    pkey, tkey = jax.random.split(key)
    params = init_params(pkey, vocab_size, n_embd, block_size, n_layer,
                         q_compression_dim, kv_compression_dim)
    tokens = jax.random.randint(tkey, (B, T), 0, vocab_size, dtype=jnp.int32)

    fwd = jax.jit(functools.partial(gpt_forward, n_head=n_head))
    logits = fwd(params, tokens)
    logits = jax.block_until_ready(logits)

    assert logits.shape == (B, T, vocab_size)
    assert bool(jnp.all(jnp.isfinite(logits)))
    print("KERNEL_OK")
</pallas_src>

<mosaic_0001>
module attributes {stable_mosaic.version = 11 : i64} {
  func.func @_ffn_block_kernel(%arg0: i32, %arg1: i32, %arg2: memref<16x64xbf16, #tpu.memory_space<vmem>>, %arg3: memref<1x64xf32, #tpu.memory_space<vmem>>, %arg4: memref<1x64xf32, #tpu.memory_space<vmem>>, %arg5: memref<64x128xbf16, #tpu.memory_space<vmem>>, %arg6: memref<1x128xf32, #tpu.memory_space<vmem>>, %arg7: memref<128x64xbf16, #tpu.memory_space<vmem>>, %arg8: memref<1x64xf32, #tpu.memory_space<vmem>>, %arg9: memref<16x64xbf16, #tpu.memory_space<vmem>>, %arg10: memref<16x64xbf16, #tpu.memory_space<vmem>>, %arg11: memref<16x64xf32, #tpu.memory_space<vmem>>) attributes {dimension_semantics = [#tpu.dimension_semantics<parallel>, #tpu.dimension_semantics<arbitrary>], iteration_bounds = array<i64: 2, 2>, scalar_prefetch = 0 : i64, scratch_operands = 2 : i64, tpu.core_type = #tpu.core_type<tc>, window_params = [{transform_indices = @transform_0, window_bounds = array<i64: 16, 64>}, {pipeline_mode = #tpu.pipeline_mode<synchronous>, transform_indices = @transform_1, window_bounds = array<i64: 1, 64>}, {pipeline_mode = #tpu.pipeline_mode<synchronous>, transform_indices = @transform_2, window_bounds = array<i64: 1, 64>}, {transform_indices = @transform_3, window_bounds = array<i64: 64, 128>}, {transform_indices = @transform_4, window_bounds = array<i64: 1, 128>}, {transform_indices = @transform_5, window_bounds = array<i64: 128, 64>}, {pipeline_mode = #tpu.pipeline_mode<synchronous>, transform_indices = @transform_6, window_bounds = array<i64: 1, 64>}, {transform_indices = @transform_7, window_bounds = array<i64: 16, 64>}]} {
    %c0_i32 = arith.constant 0 : i32
    %0 = arith.cmpi eq, %arg1, %c0_i32 : i32
    %1 = arith.extui %0 : i1 to i32
    %c0_i32_0 = arith.constant 0 : i32
    %2 = arith.cmpi ne, %1, %c0_i32_0 : i32
    scf.if %2 {
      %c0_17 = arith.constant 0 : index
      %c0_18 = arith.constant 0 : index
      %26 = vector.load %arg2[%c0_17, %c0_18] : memref<16x64xbf16, #tpu.memory_space<vmem>>, vector<16x64xbf16>
      %27 = arith.extf %26 : vector<16x64xbf16> to vector<16x64xf32>
      %c0_19 = arith.constant 0 : index
      %c0_20 = arith.constant 0 : index
      %28 = vector.load %arg3[%c0_19, %c0_20] : memref<1x64xf32, #tpu.memory_space<vmem>>, vector<1x64xf32>
      %c0_21 = arith.constant 0 : index
      %c0_22 = arith.constant 0 : index
      %29 = vector.load %arg4[%c0_21, %c0_22] : memref<1x64xf32, #tpu.memory_space<vmem>>, vector<1x64xf32>
      %cst_23 = arith.constant dense<0.000000e+00> : vector<16xf32>
      %30 = vector.multi_reduction <add>, %27, %cst_23 [1] : vector<16x64xf32> to vector<16xf32>
      %31 = vector.shape_cast %30 : vector<16xf32> to vector<16x1xf32>
      %cst_24 = arith.constant 6.400000e+01 : f32
      %32 = vector.broadcast %cst_24 : f32 to vector<16x1xf32>
      %33 = arith.divf %31, %32 : vector<16x1xf32>
      %34 = vector.broadcast %33 : vector<16x1xf32> to vector<16x64xf32>
      %35 = arith.subf %27, %34 : vector<16x64xf32>
      %36 = arith.mulf %35, %35 : vector<16x64xf32>
      %cst_25 = arith.constant dense<0.000000e+00> : vector<16xf32>
      %37 = vector.multi_reduction <add>, %36, %cst_25 [1] : vector<16x64xf32> to vector<16xf32>
      %38 = vector.shape_cast %37 : vector<16xf32> to vector<16x1xf32>
      %cst_26 = arith.constant 6.400000e+01 : f32
      %39 = vector.broadcast %cst_26 : f32 to vector<16x1xf32>
      %40 = arith.divf %38, %39 : vector<16x1xf32>
      %41 = vector.broadcast %33 : vector<16x1xf32> to vector<16x64xf32>
      %42 = arith.subf %27, %41 : vector<16x64xf32>
      %cst_27 = arith.constant 9.99999974E-6 : f32
      %43 = vector.broadcast %cst_27 : f32 to vector<16x1xf32>
      %44 = arith.addf %40, %43 : vector<16x1xf32>
      %45 = math.rsqrt %44 : vector<16x1xf32>
      %46 = vector.broadcast %45 : vector<16x1xf32> to vector<16x64xf32>
      %47 = arith.mulf %42, %46 : vector<16x64xf32>
      %48 = vector.broadcast %28 : vector<1x64xf32> to vector<16x64xf32>
      %49 = arith.mulf %47, %48 : vector<16x64xf32>
      %50 = vector.broadcast %29 : vector<1x64xf32> to vector<16x64xf32>
      %51 = arith.addf %49, %50 : vector<16x64xf32>
      %52 = arith.truncf %51 : vector<16x64xf32> to vector<16x64xbf16>
      %c0_28 = arith.constant 0 : index
      %c0_29 = arith.constant 0 : index
      %53 = vector.load %arg10[%c0_28, %c0_29] : memref<16x64xbf16, #tpu.memory_space<vmem>>, vector<16x64xbf16>
      tpu.vector_store %arg10[%c0_28, %c0_29], %52 {strides = array<i32>} : memref<16x64xbf16, #tpu.memory_space<vmem>>, vector<16x64xbf16>,
      %cst_30 = arith.constant 0.000000e+00 : f32
      %54 = vector.broadcast %cst_30 : f32 to vector<16x64xf32>
      %c0_31 = arith.constant 0 : index
      %c0_32 = arith.constant 0 : index
      %55 = vector.load %arg11[%c0_31, %c0_32] : memref<16x64xf32, #tpu.memory_space<vmem>>, vector<16x64xf32>
      tpu.vector_store %arg11[%c0_31, %c0_32], %54 {strides = array<i32>} : memref<16x64xf32, #tpu.memory_space<vmem>>, vector<16x64xf32>,
    } else {
    }
    %c0 = arith.constant 0 : index
    %c0_1 = arith.constant 0 : index
    %3 = vector.load %arg10[%c0, %c0_1] : memref<16x64xbf16, #tpu.memory_space<vmem>>, vector<16x64xbf16>
    %c0_2 = arith.constant 0 : index
    %c0_3 = arith.constant 0 : index
    %4 = vector.load %arg5[%c0_2, %c0_3] : memref<64x128xbf16, #tpu.memory_space<vmem>>, vector<64x128xbf16>
    %cst = arith.constant dense<0.000000e+00> : vector<16x128xf32>
    %5 = tpu.matmul %3, %4, %cst {dimension_numbers = #tpu.dot_dimension_numbers<[1], [0], [0], [1], [0, 0, 1, 1], [], []>} : vector<16x64xbf16>, vector<64x128xbf16>, vector<16x128xf32> -> vector<16x128xf32>
    %c0_4 = arith.constant 0 : index
    %c0_5 = arith.constant 0 : index
    %6 = vector.load %arg6[%c0_4, %c0_5] : memref<1x128xf32, #tpu.memory_space<vmem>>, vector<1x128xf32>
    %7 = vector.broadcast %6 : vector<1x128xf32> to vector<16x128xf32>
    %8 = arith.addf %5, %7 : vector<16x128xf32>
    %cst_6 = arith.constant 5.000000e-01 : f32
    %9 = vector.broadcast %cst_6 : f32 to vector<16x128xf32>
    %10 = arith.mulf %9, %8 : vector<16x128xf32>
    %cst_7 = arith.constant 0.707106769 : f32
    %11 = vector.broadcast %cst_7 : f32 to vector<16x128xf32>
    %12 = arith.mulf %8, %11 : vector<16x128xf32>
    %13 = math.erf %12 : vector<16x128xf32>
    %cst_8 = arith.constant 1.000000e+00 : f32
    %14 = vector.broadcast %cst_8 : f32 to vector<16x128xf32>
    %15 = arith.addf %14, %13 : vector<16x128xf32>
    %16 = arith.mulf %10, %15 : vector<16x128xf32>
    %c0_9 = arith.constant 0 : index
    %c0_10 = arith.constant 0 : index
    %17 = vector.load %arg11[%c0_9, %c0_10] : memref<16x64xf32, #tpu.memory_space<vmem>>, vector<16x64xf32>
    %18 = arith.truncf %16 : vector<16x128xf32> to vector<16x128xbf16>
    %c0_11 = arith.constant 0 : index
    %c0_12 = arith.constant 0 : index
    %19 = vector.load %arg7[%c0_11, %c0_12] : memref<128x64xbf16, #tpu.memory_space<vmem>>, vector<128x64xbf16>
    %cst_13 = arith.constant dense<0.000000e+00> : vector<16x64xf32>
    %20 = tpu.matmul %18, %19, %cst_13 {dimension_numbers = #tpu.dot_dimension_numbers<[1], [0], [0], [1], [0, 0, 1, 1], [], []>} : vector<16x128xbf16>, vector<128x64xbf16>, vector<16x64xf32> -> vector<16x64xf32>
    %21 = arith.addf %17, %20 : vector<16x64xf32>
    %c0_14 = arith.constant 0 : index
    %c0_15 = arith.constant 0 : index
    %22 = vector.load %arg11[%c0_14, %c0_15] : memref<16x64xf32, #tpu.memory_space<vmem>>, vector<16x64xf32>
    tpu.vector_store %arg11[%c0_14, %c0_15], %21 {strides = array<i32>} : memref<16x64xf32, #tpu.memory_space<vmem>>, vector<16x64xf32>,
    %c1_i32 = arith.constant 1 : i32
    %23 = arith.cmpi eq, %arg1, %c1_i32 : i32
    %24 = arith.extui %23 : i1 to i32
    %c0_i32_16 = arith.constant 0 : i32
    %25 = arith.cmpi ne, %24, %c0_i32_16 : i32
    scf.if %25 {
      %c0_17 = arith.constant 0 : index
      %c0_18 = arith.constant 0 : index
      %26 = vector.load %arg2[%c0_17, %c0_18] : memref<16x64xbf16, #tpu.memory_space<vmem>>, vector<16x64xbf16>
      %27 = arith.extf %26 : vector<16x64xbf16> to vector<16x64xf32>
      %c0_19 = arith.constant 0 : index
      %c0_20 = arith.constant 0 : index
      %28 = vector.load %arg11[%c0_19, %c0_20] : memref<16x64xf32, #tpu.memory_space<vmem>>, vector<16x64xf32>
      %29 = arith.addf %27, %28 : vector<16x64xf32>
      %c0_21 = arith.constant 0 : index
      %c0_22 = arith.constant 0 : index
      %30 = vector.load %arg8[%c0_21, %c0_22] : memref<1x64xf32, #tpu.memory_space<vmem>>, vector<1x64xf32>
      %31 = vector.broadcast %30 : vector<1x64xf32> to vector<16x64xf32>
      %32 = arith.addf %29, %31 : vector<16x64xf32>
      %33 = arith.truncf %32 : vector<16x64xf32> to vector<16x64xbf16>
      %c0_23 = arith.constant 0 : index
      %c0_24 = arith.constant 0 : index
      %34 = vector.load %arg9[%c0_23, %c0_24] : memref<16x64xbf16, #tpu.memory_space<vmem>>, vector<16x64xbf16>
      tpu.vector_store %arg9[%c0_23, %c0_24], %33 {strides = array<i32>} : memref<16x64xbf16, #tpu.memory_space<vmem>>, vector<16x64xbf16>,
    } else {
    }
    return
  }
  func.func @transform_0(%arg0: i32, %arg1: i32) -> (i32, i32) {
    %c0_i32 = arith.constant 0 : i32
    %c0_i32_0 = arith.constant 0 : i32
    return %arg0, %c0_i32 : i32, i32
  }
  func.func @transform_1(%arg0: i32, %arg1: i32) -> (i32, i32) {
    %c0_i32 = arith.constant 0 : i32
    %c0_i32_0 = arith.constant 0 : i32
    %c0_i32_1 = arith.constant 0 : i32
    return %c0_i32, %c0_i32_0 : i32, i32
  }
  func.func @transform_2(%arg0: i32, %arg1: i32) -> (i32, i32) {
    %c0_i32 = arith.constant 0 : i32
    %c0_i32_0 = arith.constant 0 : i32
    %c0_i32_1 = arith.constant 0 : i32
    return %c0_i32, %c0_i32_0 : i32, i32
  }
  func.func @transform_3(%arg0: i32, %arg1: i32) -> (i32, i32) {
    %c0_i32 = arith.constant 0 : i32
    %c0_i32_0 = arith.constant 0 : i32
    return %c0_i32, %arg1 : i32, i32
  }
  func.func @transform_4(%arg0: i32, %arg1: i32) -> (i32, i32) {
    %c0_i32 = arith.constant 0 : i32
    %c0_i32_0 = arith.constant 0 : i32
    return %c0_i32, %arg1 : i32, i32
  }
  func.func @transform_5(%arg0: i32, %arg1: i32) -> (i32, i32) {
    %c0_i32 = arith.constant 0 : i32
    %c0_i32_0 = arith.constant 0 : i32
    return %arg1, %c0_i32 : i32, i32
  }
  func.func @transform_6(%arg0: i32, %arg1: i32) -> (i32, i32) {
    %c0_i32 = arith.constant 0 : i32
    %c0_i32_0 = arith.constant 0 : i32
    %c0_i32_1 = arith.constant 0 : i32
    return %c0_i32, %c0_i32_0 : i32, i32
  }
  func.func @transform_7(%arg0: i32, %arg1: i32) -> (i32, i32) {
    %c0_i32 = arith.constant 0 : i32
    %c0_i32_0 = arith.constant 0 : i32
    return %arg0, %c0_i32 : i32, i32
  }
}

module attributes {stable_mosaic.version = 11 : i64} {
  func.func @_final_head_kernel(%arg0: i32, %arg1: i32, %arg2: memref<16x64xbf16, #tpu.memory_space<vmem>>, %arg3: memref<1x64xf32, #tpu.memory_space<vmem>>, %arg4: memref<1x64xf32, #tpu.memory_space<vmem>>, %arg5: memref<64x512xbf16, #tpu.memory_space<vmem>>, %arg6: memref<1x512xf32, #tpu.memory_space<vmem>>, %arg7: memref<16x512xf32, #tpu.memory_space<vmem>>, %arg8: memref<16x64xbf16, #tpu.memory_space<vmem>>) attributes {dimension_semantics = [#tpu.dimension_semantics<parallel>, #tpu.dimension_semantics<arbitrary>], iteration_bounds = array<i64: 2, 2>, scalar_prefetch = 0 : i64, scratch_operands = 1 : i64, tpu.core_type = #tpu.core_type<tc>, window_params = [{transform_indices = @transform_0, window_bounds = array<i64: 16, 64>}, {pipeline_mode = #tpu.pipeline_mode<synchronous>, transform_indices = @transform_1, window_bounds = array<i64: 1, 64>}, {pipeline_mode = #tpu.pipeline_mode<synchronous>, transform_indices = @transform_2, window_bounds = array<i64: 1, 64>}, {transform_indices = @transform_3, window_bounds = array<i64: 64, 512>}, {transform_indices = @transform_4, window_bounds = array<i64: 1, 512>}, {transform_indices = @transform_5, window_bounds = array<i64: 16, 512>}]} {
    %c0_i32 = arith.constant 0 : i32
    %0 = arith.cmpi eq, %arg1, %c0_i32 : i32
    %1 = arith.extui %0 : i1 to i32
    %c0_i32_0 = arith.constant 0 : i32
    %2 = arith.cmpi ne, %1, %c0_i32_0 : i32
    scf.if %2 {
      %c0_8 = arith.constant 0 : index
      %c0_9 = arith.constant 0 : index
      %10 = vector.load %arg2[%c0_8, %c0_9] : memref<16x64xbf16, #tpu.memory_space<vmem>>, vector<16x64xbf16>
      %11 = arith.extf %10 : vector<16x64xbf16> to vector<16x64xf32>
      %c0_10 = arith.constant 0 : index
      %c0_11 = arith.constant 0 : index
      %12 = vector.load %arg3[%c0_10, %c0_11] : memref<1x64xf32, #tpu.memory_space<vmem>>, vector<1x64xf32>
      %c0_12 = arith.constant 0 : index
      %c0_13 = arith.constant 0 : index
      %13 = vector.load %arg4[%c0_12, %c0_13] : memref<1x64xf32, #tpu.memory_space<vmem>>, vector<1x64xf32>
      %cst_14 = arith.constant dense<0.000000e+00> : vector<16xf32>
      %14 = vector.multi_reduction <add>, %11, %cst_14 [1] : vector<16x64xf32> to vector<16xf32>
      %15 = vector.shape_cast %14 : vector<16xf32> to vector<16x1xf32>
      %cst_15 = arith.constant 6.400000e+01 : f32
      %16 = vector.broadcast %cst_15 : f32 to vector<16x1xf32>
      %17 = arith.divf %15, %16 : vector<16x1xf32>
      %18 = vector.broadcast %17 : vector<16x1xf32> to vector<16x64xf32>
      %19 = arith.subf %11, %18 : vector<16x64xf32>
      %20 = arith.mulf %19, %19 : vector<16x64xf32>
      %cst_16 = arith.constant dense<0.000000e+00> : vector<16xf32>
      %21 = vector.multi_reduction <add>, %20, %cst_16 [1] : vector<16x64xf32> to vector<16xf32>
      %22 = vector.shape_cast %21 : vector<16xf32> to vector<16x1xf32>
      %cst_17 = arith.constant 6.400000e+01 : f32
      %23 = vector.broadcast %cst_17 : f32 to vector<16x1xf32>
      %24 = arith.divf %22, %23 : vector<16x1xf32>
      %25 = vector.broadcast %17 : vector<16x1xf32> to vector<16x64xf32>
      %26 = arith.subf %11, %25 : vector<16x64xf32>
      %cst_18 = arith.constant 9.99999974E-6 : f32
      %27 = vector.broadcast %cst_18 : f32 to vector<16x1xf32>
      %28 = arith.addf %24, %27 : vector<16x1xf32>
      %29 = math.rsqrt %28 : vector<16x1xf32>
      %30 = vector.broadcast %29 : vector<16x1xf32> to vector<16x64xf32>
      %31 = arith.mulf %26, %30 : vector<16x64xf32>
      %32 = vector.broadcast %12 : vector<1x64xf32> to vector<16x64xf32>
      %33 = arith.mulf %31, %32 : vector<16x64xf32>
      %34 = vector.broadcast %13 : vector<1x64xf32> to vector<16x64xf32>
      %35 = arith.addf %33, %34 : vector<16x64xf32>
      %36 = arith.truncf %35 : vector<16x64xf32> to vector<16x64xbf16>
      %c0_19 = arith.constant 0 : index
      %c0_20 = arith.constant 0 : index
      %37 = vector.load %arg8[%c0_19, %c0_20] : memref<16x64xbf16, #tpu.memory_space<vmem>>, vector<16x64xbf16>
      tpu.vector_store %arg8[%c0_19, %c0_20], %36 {strides = array<i32>} : memref<16x64xbf16, #tpu.memory_space<vmem>>, vector<16x64xbf16>,
    } else {
    }
    %c0 = arith.constant 0 : index
    %c0_1 = arith.constant 0 : index
    %3 = vector.load %arg8[%c0, %c0_1] : memref<16x64xbf16, #tpu.memory_space<vmem>>, vector<16x64xbf16>
    %c0_2 = arith.constant 0 : index
    %c0_3 = arith.constant 0 : index
    %4 = vector.load %arg5[%c0_2, %c0_3] : memref<64x512xbf16, #tpu.memory_space<vmem>>, vector<64x512xbf16>
    %cst = arith.constant dense<0.000000e+00> : vector<16x512xf32>
    %5 = tpu.matmul %3, %4, %cst {dimension_numbers = #tpu.dot_dimension_numbers<[1], [0], [0], [1], [0, 0, 1, 1], [], []>} : vector<16x64xbf16>, vector<64x512xbf16>, vector<16x512xf32> -> vector<16x512xf32>
    %c0_4 = arith.constant 0 : index
    %c0_5 = arith.constant 0 : index
    %6 = vector.load %arg6[%c0_4, %c0_5] : memref<1x512xf32, #tpu.memory_space<vmem>>, vector<1x512xf32>
    %7 = vector.broadcast %6 : vector<1x512xf32> to vector<16x512xf32>
    %8 = arith.addf %5, %7 : vector<16x512xf32>
    %c0_6 = arith.constant 0 : index
    %c0_7 = arith.constant 0 : index
    %9 = vector.load %arg7[%c0_6, %c0_7] : memref<16x512xf32, #tpu.memory_space<vmem>>, vector<16x512xf32>
    tpu.vector_store %arg7[%c0_6, %c0_7], %8 {strides = array<i32>} : memref<16x512xf32, #tpu.memory_space<vmem>>, vector<16x512xf32>,
    return
  }
  func.func @transform_0(%arg0: i32, %arg1: i32) -> (i32, i32) {
    %c0_i32 = arith.constant 0 : i32
    %c0_i32_0 = arith.constant 0 : i32
    return %arg0, %c0_i32 : i32, i32
  }
  func.func @transform_1(%arg0: i32, %arg1: i32) -> (i32, i32) {
    %c0_i32 = arith.constant 0 : i32
    %c0_i32_0 = arith.constant 0 : i32
    %c0_i32_1 = arith.constant 0 : i32
    return %c0_i32, %c0_i32_0 : i32, i32
  }
  func.func @transform_2(%arg0: i32, %arg1: i32) -> (i32, i32) {
    %c0_i32 = arith.constant 0 : i32
    %c0_i32_0 = arith.constant 0 : i32
    %c0_i32_1 = arith.constant 0 : i32
    return %c0_i32, %c0_i32_0 : i32, i32
  }
  func.func @transform_3(%arg0: i32, %arg1: i32) -> (i32, i32) {
    %c0_i32 = arith.constant 0 : i32
    %c0_i32_0 = arith.constant 0 : i32
    return %c0_i32, %arg1 : i32, i32
  }
  func.func @transform_4(%arg0: i32, %arg1: i32) -> (i32, i32) {
    %c0_i32 = arith.constant 0 : i32
    %c0_i32_0 = arith.constant 0 : i32
    return %c0_i32, %arg1 : i32, i32
  }
  func.func @transform_5(%arg0: i32, %arg1: i32) -> (i32, i32) {
    %c0_i32 = arith.constant 0 : i32
    return %arg0, %arg1 : i32, i32
  }
}

module attributes {stable_mosaic.version = 11 : i64} {
  func.func @_mla_block_kernel(%arg0: i32, %arg1: memref<1x16x64xbf16, #tpu.memory_space<vmem>>, %arg2: memref<1x64xf32, #tpu.memory_space<vmem>>, %arg3: memref<1x64xf32, #tpu.memory_space<vmem>>, %arg4: memref<64x32xbf16, #tpu.memory_space<vmem>>, %arg5: memref<1x32xf32, #tpu.memory_space<vmem>>, %arg6: memref<1x32xf32, #tpu.memory_space<vmem>>, %arg7: memref<32x64xbf16, #tpu.memory_space<vmem>>, %arg8: memref<64x32xbf16, #tpu.memory_space<vmem>>, %arg9: memref<1x32xf32, #tpu.memory_space<vmem>>, %arg10: memref<1x32xf32, #tpu.memory_space<vmem>>, %arg11: memref<32x64xbf16, #tpu.memory_space<vmem>>, %arg12: memref<32x64xbf16, #tpu.memory_space<vmem>>, %arg13: memref<64x64xbf16, #tpu.memory_space<vmem>>, %arg14: memref<1x16x64xbf16, #tpu.memory_space<vmem>>, %arg15: memref<16x64xbf16, #tpu.memory_space<vmem>>) attributes {dimension_semantics = [#tpu.dimension_semantics<parallel>], iteration_bounds = array<i64: 2>, scalar_prefetch = 0 : i64, scratch_operands = 1 : i64, tpu.core_type = #tpu.core_type<tc>, window_params = [{transform_indices = @transform_0, window_bounds = array<i64: 1, 16, 64>}, {pipeline_mode = #tpu.pipeline_mode<synchronous>, transform_indices = @transform_1, window_bounds = array<i64: 1, 64>}, {pipeline_mode = #tpu.pipeline_mode<synchronous>, transform_indices = @transform_2, window_bounds = array<i64: 1, 64>}, {pipeline_mode = #tpu.pipeline_mode<synchronous>, transform_indices = @transform_3, window_bounds = array<i64: 64, 32>}, {pipeline_mode = #tpu.pipeline_mode<synchronous>, transform_indices = @transform_4, window_bounds = array<i64: 1, 32>}, {pipeline_mode = #tpu.pipeline_mode<synchronous>, transform_indices = @transform_5, window_bounds = array<i64: 1, 32>}, {pipeline_mode = #tpu.pipeline_mode<synchronous>, transform_indices = @transform_6, window_bounds = array<i64: 32, 64>}, {pipeline_mode = #tpu.pipeline_mode<synchronous>, transform_indices = @transform_7, window_bounds = array<i64: 64, 32>}, {pipeline_mode = #tpu.pipeline_mode<synchronous>, transform_indices = @transform_8, window_bounds = array<i64: 1, 32>}, {pipeline_mode = #tpu.pipeline_mode<synchronous>, transform_indices = @transform_9, window_bounds = array<i64: 1, 32>}, {pipeline_mode = #tpu.pipeline_mode<synchronous>, transform_indices = @transform_10, window_bounds = array<i64: 32, 64>}, {pipeline_mode = #tpu.pipeline_mode<synchronous>, transform_indices = @transform_11, window_bounds = array<i64: 32, 64>}, {pipeline_mode = #tpu.pipeline_mode<synchronous>, transform_indices = @transform_12, window_bounds = array<i64: 64, 64>}, {transform_indices = @transform_13, window_bounds = array<i64: 1, 16, 64>}]} {
    %c0 = arith.constant 0 : index
    %c0_0 = arith.constant 0 : index
    %c0_1 = arith.constant 0 : index
    %0 = vector.load %arg1[%c0, %c0_0, %c0_1] : memref<1x16x64xbf16, #tpu.memory_space<vmem>>, vector<1x16x64xbf16>
    %1 = vector.shape_cast %0 : vector<1x16x64xbf16> to vector<16x64xbf16>
    %2 = arith.extf %1 : vector<16x64xbf16> to vector<16x64xf32>
    %c0_2 = arith.constant 0 : index
    %c0_3 = arith.constant 0 : index
    %3 = vector.load %arg2[%c0_2, %c0_3] : memref<1x64xf32, #tpu.memory_space<vmem>>, vector<1x64xf32>
    %c0_4 = arith.constant 0 : index
    %c0_5 = arith.constant 0 : index
    %4 = vector.load %arg3[%c0_4, %c0_5] : memref<1x64xf32, #tpu.memory_space<vmem>>, vector<1x64xf32>
    %cst = arith.constant dense<0.000000e+00> : vector<16xf32>
    %5 = vector.multi_reduction <add>, %2, %cst [1] : vector<16x64xf32> to vector<16xf32>
    %6 = vector.shape_cast %5 : vector<16xf32> to vector<16x1xf32>
    %cst_6 = arith.constant 6.400000e+01 : f32
    %7 = vector.broadcast %cst_6 : f32 to vector<16x1xf32>
    %8 = arith.divf %6, %7 : vector<16x1xf32>
    %9 = vector.broadcast %8 : vector<16x1xf32> to vector<16x64xf32>
    %10 = arith.subf %2, %9 : vector<16x64xf32>
    %11 = arith.mulf %10, %10 : vector<16x64xf32>
    %cst_7 = arith.constant dense<0.000000e+00> : vector<16xf32>
    %12 = vector.multi_reduction <add>, %11, %cst_7 [1] : vector<16x64xf32> to vector<16xf32>
    %13 = vector.shape_cast %12 : vector<16xf32> to vector<16x1xf32>
    %cst_8 = arith.constant 6.400000e+01 : f32
    %14 = vector.broadcast %cst_8 : f32 to vector<16x1xf32>
    %15 = arith.divf %13, %14 : vector<16x1xf32>
    %16 = vector.broadcast %8 : vector<16x1xf32> to vector<16x64xf32>
    %17 = arith.subf %2, %16 : vector<16x64xf32>
    %cst_9 = arith.constant 9.99999974E-6 : f32
    %18 = vector.broadcast %cst_9 : f32 to vector<16x1xf32>
    %19 = arith.addf %15, %18 : vector<16x1xf32>
    %20 = math.rsqrt %19 : vector<16x1xf32>
    %21 = vector.broadcast %20 : vector<16x1xf32> to vector<16x64xf32>
    %22 = arith.mulf %17, %21 : vector<16x64xf32>
    %23 = vector.broadcast %3 : vector<1x64xf32> to vector<16x64xf32>
    %24 = arith.mulf %22, %23 : vector<16x64xf32>
    %25 = vector.broadcast %4 : vector<1x64xf32> to vector<16x64xf32>
    %26 = arith.addf %24, %25 : vector<16x64xf32>
    %27 = arith.truncf %26 : vector<16x64xf32> to vector<16x64xbf16>
    %c0_10 = arith.constant 0 : index
    %c0_11 = arith.constant 0 : index
    %28 = vector.load %arg4[%c0_10, %c0_11] : memref<64x32xbf16, #tpu.memory_space<vmem>>, vector<64x32xbf16>
    %cst_12 = arith.constant dense<0.000000e+00> : vector<16x32xf32>
    %29 = tpu.matmul %27, %28, %cst_12 {dimension_numbers = #tpu.dot_dimension_numbers<[1], [0], [0], [1], [0, 0, 1, 1], [], []>} : vector<16x64xbf16>, vector<64x32xbf16>, vector<16x32xf32> -> vector<16x32xf32>
    %c0_13 = arith.constant 0 : index
    %c0_14 = arith.constant 0 : index
    %30 = vector.load %arg5[%c0_13, %c0_14] : memref<1x32xf32, #tpu.memory_space<vmem>>, vector<1x32xf32>
    %c0_15 = arith.constant 0 : index
    %c0_16 = arith.constant 0 : index
    %31 = vector.load %arg6[%c0_15, %c0_16] : memref<1x32xf32, #tpu.memory_space<vmem>>, vector<1x32xf32>
    %cst_17 = arith.constant dense<0.000000e+00> : vector<16xf32>
    %32 = vector.multi_reduction <add>, %29, %cst_17 [1] : vector<16x32xf32> to vector<16xf32>
    %33 = vector.shape_cast %32 : vector<16xf32> to vector<16x1xf32>
    %cst_18 = arith.constant 3.200000e+01 : f32
    %34 = vector.broadcast %cst_18 : f32 to vector<16x1xf32>
    %35 = arith.divf %33, %34 : vector<16x1xf32>
    %36 = vector.broadcast %35 : vector<16x1xf32> to vector<16x32xf32>
    %37 = arith.subf %29, %36 : vector<16x32xf32>
    %38 = arith.mulf %37, %37 : vector<16x32xf32>
    %cst_19 = arith.constant dense<0.000000e+00> : vector<16xf32>
    %39 = vector.multi_reduction <add>, %38, %cst_19 [1] : vector<16x32xf32> to vector<16xf32>
    %40 = vector.shape_cast %39 : vector<16xf32> to vector<16x1xf32>
    %cst_20 = arith.constant 3.200000e+01 : f32
    %41 = vector.broadcast %cst_20 : f32 to vector<16x1xf32>
    %42 = arith.divf %40, %41 : vector<16x1xf32>
    %43 = vector.broadcast %35 : vector<16x1xf32> to vector<16x32xf32>
    %44 = arith.subf %29, %43 : vector<16x32xf32>
    %cst_21 = arith.constant 9.99999974E-6 : f32
    %45 = vector.broadcast %cst_21 : f32 to vector<16x1xf32>
    %46 = arith.addf %42, %45 : vector<16x1xf32>
    %47 = math.rsqrt %46 : vector<16x1xf32>
    %48 = vector.broadcast %47 : vector<16x1xf32> to vector<16x32xf32>
    %49 = arith.mulf %44, %48 : vector<16x32xf32>
    %50 = vector.broadcast %30 : vector<1x32xf32> to vector<16x32xf32>
    %51 = arith.mulf %49, %50 : vector<16x32xf32>
    %52 = vector.broadcast %31 : vector<1x32xf32> to vector<16x32xf32>
    %53 = arith.addf %51, %52 : vector<16x32xf32>
    %54 = arith.truncf %53 : vector<16x32xf32> to vector<16x32xbf16>
    %c0_22 = arith.constant 0 : index
    %c0_23 = arith.constant 0 : index
    %55 = vector.load %arg7[%c0_22, %c0_23] : memref<32x64xbf16, #tpu.memory_space<vmem>>, vector<32x64xbf16>
    %cst_24 = arith.constant dense<0.000000e+00> : vector<16x64xf32>
    %56 = tpu.matmul %54, %55, %cst_24 {dimension_numbers = #tpu.dot_dimension_numbers<[1], [0], [0], [1], [0, 0, 1, 1], [], []>} : vector<16x32xbf16>, vector<32x64xbf16>, vector<16x64xf32> -> vector<16x64xf32>
    %cst_25 = arith.constant 2.500000e-01 : f32
    %57 = vector.broadcast %cst_25 : f32 to vector<16x64xf32>
    %58 = arith.mulf %56, %57 : vector<16x64xf32>
    %59 = arith.truncf %58 : vector<16x64xf32> to vector<16x64xbf16>
    %c0_26 = arith.constant 0 : index
    %c0_27 = arith.constant 0 : index
    %60 = vector.load %arg8[%c0_26, %c0_27] : memref<64x32xbf16, #tpu.memory_space<vmem>>, vector<64x32xbf16>
    %cst_28 = arith.constant dense<0.000000e+00> : vector<16x32xf32>
    %61 = tpu.matmul %27, %60, %cst_28 {dimension_numbers = #tpu.dot_dimension_numbers<[1], [0], [0], [1], [0, 0, 1, 1], [], []>} : vector<16x64xbf16>, vector<64x32xbf16>, vector<16x32xf32> -> vector<16x32xf32>
    %c0_29 = arith.constant 0 : index
    %c0_30 = arith.constant 0 : index
    %62 = vector.load %arg9[%c0_29, %c0_30] : memref<1x32xf32, #tpu.memory_space<vmem>>, vector<1x32xf32>
    %c0_31 = arith.constant 0 : index
    %c0_32 = arith.constant 0 : index
    %63 = vector.load %arg10[%c0_31, %c0_32] : memref<1x32xf32, #tpu.memory_space<vmem>>, vector<1x32xf32>
    %cst_33 = arith.constant dense<0.000000e+00> : vector<16xf32>
    %64 = vector.multi_reduction <add>, %61, %cst_33 [1] : vector<16x32xf32> to vector<16xf32>
    %65 = vector.shape_cast %64 : vector<16xf32> to vector<16x1xf32>
    %cst_34 = arith.constant 3.200000e+01 : f32
    %66 = vector.broadcast %cst_34 : f32 to vector<16x1xf32>
    %67 = arith.divf %65, %66 : vector<16x1xf32>
    %68 = vector.broadcast %67 : vector<16x1xf32> to vector<16x32xf32>
    %69 = arith.subf %61, %68 : vector<16x32xf32>
    %70 = arith.mulf %69, %69 : vector<16x32xf32>
    %cst_35 = arith.constant dense<0.000000e+00> : vector<16xf32>
    %71 = vector.multi_reduction <add>, %70, %cst_35 [1] : vector<16x32xf32> to vector<16xf32>
    %72 = vector.shape_cast %71 : vector<16xf32> to vector<16x1xf32>
    %cst_36 = arith.constant 3.200000e+01 : f32
    %73 = vector.broadcast %cst_36 : f32 to vector<16x1xf32>
    %74 = arith.divf %72, %73 : vector<16x1xf32>
    %75 = vector.broadcast %67 : vector<16x1xf32> to vector<16x32xf32>
    %76 = arith.subf %61, %75 : vector<16x32xf32>
    %cst_37 = arith.constant 9.99999974E-6 : f32
    %77 = vector.broadcast %cst_37 : f32 to vector<16x1xf32>
    %78 = arith.addf %74, %77 : vector<16x1xf32>
    %79 = math.rsqrt %78 : vector<16x1xf32>
    %80 = vector.broadcast %79 : vector<16x1xf32> to vector<16x32xf32>
    %81 = arith.mulf %76, %80 : vector<16x32xf32>
    %82 = vector.broadcast %62 : vector<1x32xf32> to vector<16x32xf32>
    %83 = arith.mulf %81, %82 : vector<16x32xf32>
    %84 = vector.broadcast %63 : vector<1x32xf32> to vector<16x32xf32>
    %85 = arith.addf %83, %84 : vector<16x32xf32>
    %86 = arith.truncf %85 : vector<16x32xf32> to vector<16x32xbf16>
    %c0_38 = arith.constant 0 : index
    %c0_39 = arith.constant 0 : index
    %87 = vector.load %arg11[%c0_38, %c0_39] : memref<32x64xbf16, #tpu.memory_space<vmem>>, vector<32x64xbf16>
    %cst_40 = arith.constant dense<0.000000e+00> : vector<16x64xf32>
    %88 = tpu.matmul %86, %87, %cst_40 {dimension_numbers = #tpu.dot_dimension_numbers<[1], [0], [0], [1], [0, 0, 1, 1], [], []>} : vector<16x32xbf16>, vector<32x64xbf16>, vector<16x64xf32> -> vector<16x64xf32>
    %89 = arith.truncf %88 : vector<16x64xf32> to vector<16x64xbf16>
    %c0_41 = arith.constant 0 : index
    %c0_42 = arith.constant 0 : index
    %90 = vector.load %arg12[%c0_41, %c0_42] : memref<32x64xbf16, #tpu.memory_space<vmem>>, vector<32x64xbf16>
    %cst_43 = arith.constant dense<0.000000e+00> : vector<16x64xf32>
    %91 = tpu.matmul %86, %90, %cst_43 {dimension_numbers = #tpu.dot_dimension_numbers<[1], [0], [0], [1], [0, 0, 1, 1], [], []>} : vector<16x32xbf16>, vector<32x64xbf16>, vector<16x64xf32> -> vector<16x64xf32>
    %92 = arith.truncf %91 : vector<16x64xf32> to vector<16x64xbf16>
    %93 = tpu.iota {dimensions = array<i32: 0>} : vector<16x16xi32>
    %94 = tpu.iota {dimensions = array<i32: 1>} : vector<16x16xi32>
    %95 = arith.cmpi sle, %94, %93 : vector<16x16xi32>
    %cst_44 = arith.constant 0.000000e+00 : f32
    %cst_45 = arith.constant -1.000000e+30 : f32
    %96 = vector.broadcast %cst_44 : f32 to vector<16x16xf32>
    %97 = vector.broadcast %cst_45 : f32 to vector<16x16xf32>
    %98 = arith.select %95, %96, %97 : vector<16x16xi1>, vector<16x16xf32>
    %99 = vector.extract_strided_slice %59 {offsets = [0, 0], sizes = [16, 16], strides = [1, 1]} : vector<16x64xbf16> to vector<16x16xbf16>
    %100 = vector.extract_strided_slice %89 {offsets = [0, 0], sizes = [16, 16], strides = [1, 1]} : vector<16x64xbf16> to vector<16x16xbf16>
    %101 = vector.extract_strided_slice %92 {offsets = [0, 0], sizes = [16, 16], strides = [1, 1]} : vector<16x64xbf16> to vector<16x16xbf16>
    %cst_46 = arith.constant dense<0.000000e+00> : vector<16x16xf32>
    %102 = tpu.matmul %99, %100, %cst_46 {dimension_numbers = #tpu.dot_dimension_numbers<[1], [1], [0], [0], [0, 0, 1, 0], [], []>} : vector<16x16xbf16>, vector<16x16xbf16>, vector<16x16xf32> -> vector<16x16xf32>
    %103 = arith.addf %102, %98 : vector<16x16xf32>
    %cst_47 = arith.constant dense<0xFF800000> : vector<16xf32>
    %104 = vector.multi_reduction <maximumf>, %103, %cst_47 [1] : vector<16x16xf32> to vector<16xf32>
    %105 = vector.shape_cast %104 : vector<16xf32> to vector<16x1xf32>
    %106 = vector.broadcast %105 : vector<16x1xf32> to vector<16x16xf32>
    %107 = arith.subf %103, %106 : vector<16x16xf32>
    %108 = math.exp %107 : vector<16x16xf32>
    %cst_48 = arith.constant dense<0.000000e+00> : vector<16xf32>
    %109 = vector.multi_reduction <add>, %108, %cst_48 [1] : vector<16x16xf32> to vector<16xf32>
    %110 = vector.shape_cast %109 : vector<16xf32> to vector<16x1xf32>
    %111 = tpu.reciprocal %110 {approx = true} : vector<16x1xf32> -> vector<16x1xf32>
    %112 = vector.broadcast %111 : vector<16x1xf32> to vector<16x16xf32>
    %113 = arith.mulf %108, %112 : vector<16x16xf32>
    %114 = arith.truncf %113 : vector<16x16xf32> to vector<16x16xbf16>
    %cst_49 = arith.constant dense<0.000000e+00> : vector<16x16xf32>
    %115 = tpu.matmul %114, %101, %cst_49 {dimension_numbers = #tpu.dot_dimension_numbers<[1], [0], [0], [1], [0, 0, 1, 1], [], []>} : vector<16x16xbf16>, vector<16x16xbf16>, vector<16x16xf32> -> vector<16x16xf32>
    %116 = arith.truncf %115 : vector<16x16xf32> to vector<16x16xbf16>
    %c0_50 = arith.constant 0 : index
    %c0_51 = arith.constant 0 : index
    %117 = vector.load %arg15[%c0_50, %c0_51] : memref<16x64xbf16, #tpu.memory_space<vmem>>, vector<16x16xbf16>
    tpu.vector_store %arg15[%c0_50, %c0_51], %116 {strides = array<i32>} : memref<16x64xbf16, #tpu.memory_space<vmem>>, vector<16x16xbf16>,
    %118 = vector.extract_strided_slice %59 {offsets = [0, 16], sizes = [16, 16], strides = [1, 1]} : vector<16x64xbf16> to vector<16x16xbf16>
    %119 = vector.extract_strided_slice %89 {offsets = [0, 16], sizes = [16, 16], strides = [1, 1]} : vector<16x64xbf16> to vector<16x16xbf16>
    %120 = vector.extract_strided_slice %92 {offsets = [0, 16], sizes = [16, 16], strides = [1, 1]} : vector<16x64xbf16> to vector<16x16xbf16>
    %cst_52 = arith.constant dense<0.000000e+00> : vector<16x16xf32>
    %121 = tpu.matmul %118, %119, %cst_52 {dimension_numbers = #tpu.dot_dimension_numbers<[1], [1], [0], [0], [0, 0, 1, 0], [], []>} : vector<16x16xbf16>, vector<16x16xbf16>, vector<16x16xf32> -> vector<16x16xf32>
    %122 = arith.addf %121, %98 : vector<16x16xf32>
    %cst_53 = arith.constant dense<0xFF800000> : vector<16xf32>
    %123 = vector.multi_reduction <maximumf>, %122, %cst_53 [1] : vector<16x16xf32> to vector<16xf32>
    %124 = vector.shape_cast %123 : vector<16xf32> to vector<16x1xf32>
    %125 = vector.broadcast %124 : vector<16x1xf32> to vector<16x16xf32>
    %126 = arith.subf %122, %125 : vector<16x16xf32>
    %127 = math.exp %126 : vector<16x16xf32>
    %cst_54 = arith.constant dense<0.000000e+00> : vector<16xf32>
    %128 = vector.multi_reduction <add>, %127, %cst_54 [1] : vector<16x16xf32> to vector<16xf32>
    %129 = vector.shape_cast %128 : vector<16xf32> to vector<16x1xf32>
    %130 = tpu.reciprocal %129 {approx = true} : vector<16x1xf32> -> vector<16x1xf32>
    %131 = vector.broadcast %130 : vector<16x1xf32> to vector<16x16xf32>
    %132 = arith.mulf %127, %131 : vector<16x16xf32>
    %133 = arith.truncf %132 : vector<16x16xf32> to vector<16x16xbf16>
    %cst_55 = arith.constant dense<0.000000e+00> : vector<16x16xf32>
    %134 = tpu.matmul %133, %120, %cst_55 {dimension_numbers = #tpu.dot_dimension_numbers<[1], [0], [0], [1], [0, 0, 1, 1], [], []>} : vector<16x16xbf16>, vector<16x16xbf16>, vector<16x16xf32> -> vector<16x16xf32>
    %135 = arith.truncf %134 : vector<16x16xf32> to vector<16x16xbf16>
    %c0_56 = arith.constant 0 : index
    %c16 = arith.constant 16 : index
    %136 = vector.load %arg15[%c0_56, %c16] : memref<16x64xbf16, #tpu.memory_space<vmem>>, vector<16x16xbf16>
    tpu.vector_store %arg15[%c0_56, %c16], %135 {strides = array<i32>} : memref<16x64xbf16, #tpu.memory_space<vmem>>, vector<16x16xbf16>,
    %137 = vector.extract_strided_slice %59 {offsets = [0, 32], sizes = [16, 16], strides = [1, 1]} : vector<16x64xbf16> to vector<16x16xbf16>
    %138 = vector.extract_strided_slice %89 {offsets = [0, 32], sizes = [16, 16], strides = [1, 1]} : vector<16x64xbf16> to vector<16x16xbf16>
    %139 = vector.extract_strided_slice %92 {offsets = [0, 32], sizes = [16, 16], strides = [1, 1]} : vector<16x64xbf16> to vector<16x16xbf16>
    %cst_57 = arith.constant dense<0.000000e+00> : vector<16x16xf32>
    %140 = tpu.matmul %137, %138, %cst_57 {dimension_numbers = #tpu.dot_dimension_numbers<[1], [1], [0], [0], [0, 0, 1, 0], [], []>} : vector<16x16xbf16>, vector<16x16xbf16>, vector<16x16xf32> -> vector<16x16xf32>
    %141 = arith.addf %140, %98 : vector<16x16xf32>
    %cst_58 = arith.constant dense<0xFF800000> : vector<16xf32>
    %142 = vector.multi_reduction <maximumf>, %141, %cst_58 [1] : vector<16x16xf32> to vector<16xf32>
    %143 = vector.shape_cast %142 : vector<16xf32> to vector<16x1xf32>
    %144 = vector.broadcast %143 : vector<16x1xf32> to vector<16x16xf32>
    %145 = arith.subf %141, %144 : vector<16x16xf32>
    %146 = math.exp %145 : vector<16x16xf32>
    %cst_59 = arith.constant dense<0.000000e+00> : vector<16xf32>
    %147 = vector.multi_reduction <add>, %146, %cst_59 [1] : vector<16x16xf32> to vector<16xf32>
    %148 = vector.shape_cast %147 : vector<16xf32> to vector<16x1xf32>
    %149 = tpu.reciprocal %148 {approx = true} : vector<16x1xf32> -> vector<16x1xf32>
    %150 = vector.broadcast %149 : vector<16x1xf32> to vector<16x16xf32>
    %151 = arith.mulf %146, %150 : vector<16x16xf32>
    %152 = arith.truncf %151 : vector<16x16xf32> to vector<16x16xbf16>
    %cst_60 = arith.constant dense<0.000000e+00> : vector<16x16xf32>
    %153 = tpu.matmul %152, %139, %cst_60 {dimension_numbers = #tpu.dot_dimension_numbers<[1], [0], [0], [1], [0, 0, 1, 1], [], []>} : vector<16x16xbf16>, vector<16x16xbf16>, vector<16x16xf32> -> vector<16x16xf32>
    %154 = arith.truncf %153 : vector<16x16xf32> to vector<16x16xbf16>
    %c0_61 = arith.constant 0 : index
    %c32 = arith.constant 32 : index
    %155 = vector.load %arg15[%c0_61, %c32] : memref<16x64xbf16, #tpu.memory_space<vmem>>, vector<16x16xbf16>
    tpu.vector_store %arg15[%c0_61, %c32], %154 {strides = array<i32>} : memref<16x64xbf16, #tpu.memory_space<vmem>>, vector<16x16xbf16>,
    %156 = vector.extract_strided_slice %59 {offsets = [0, 48], sizes = [16, 16], strides = [1, 1]} : vector<16x64xbf16> to vector<16x16xbf16>
    %157 = vector.extract_strided_slice %89 {offsets = [0, 48], sizes = [16, 16], strides = [1, 1]} : vector<16x64xbf16> to vector<16x16xbf16>
    %158 = vector.extract_strided_slice %92 {offsets = [0, 48], sizes = [16, 16], strides = [1, 1]} : vector<16x64xbf16> to vector<16x16xbf16>
    %cst_62 = arith.constant dense<0.000000e+00> : vector<16x16xf32>
    %159 = tpu.matmul %156, %157, %cst_62 {dimension_numbers = #tpu.dot_dimension_numbers<[1], [1], [0], [0], [0, 0, 1, 0], [], []>} : vector<16x16xbf16>, vector<16x16xbf16>, vector<16x16xf32> -> vector<16x16xf32>
    %160 = arith.addf %159, %98 : vector<16x16xf32>
    %cst_63 = arith.constant dense<0xFF800000> : vector<16xf32>
    %161 = vector.multi_reduction <maximumf>, %160, %cst_63 [1] : vector<16x16xf32> to vector<16xf32>
    %162 = vector.shape_cast %161 : vector<16xf32> to vector<16x1xf32>
    %163 = vector.broadcast %162 : vector<16x1xf32> to vector<16x16xf32>
    %164 = arith.subf %160, %163 : vector<16x16xf32>
    %165 = math.exp %164 : vector<16x16xf32>
    %cst_64 = arith.constant dense<0.000000e+00> : vector<16xf32>
    %166 = vector.multi_reduction <add>, %165, %cst_64 [1] : vector<16x16xf32> to vector<16xf32>
    %167 = vector.shape_cast %166 : vector<16xf32> to vector<16x1xf32>
    %168 = tpu.reciprocal %167 {approx = true} : vector<16x1xf32> -> vector<16x1xf32>
    %169 = vector.broadcast %168 : vector<16x1xf32> to vector<16x16xf32>
    %170 = arith.mulf %165, %169 : vector<16x16xf32>
    %171 = arith.truncf %170 : vector<16x16xf32> to vector<16x16xbf16>
    %cst_65 = arith.constant dense<0.000000e+00> : vector<16x16xf32>
    %172 = tpu.matmul %171, %158, %cst_65 {dimension_numbers = #tpu.dot_dimension_numbers<[1], [0], [0], [1], [0, 0, 1, 1], [], []>} : vector<16x16xbf16>, vector<16x16xbf16>, vector<16x16xf32> -> vector<16x16xf32>
    %173 = arith.truncf %172 : vector<16x16xf32> to vector<16x16xbf16>
    %c0_66 = arith.constant 0 : index
    %c48 = arith.constant 48 : index
    %174 = vector.load %arg15[%c0_66, %c48] : memref<16x64xbf16, #tpu.memory_space<vmem>>, vector<16x16xbf16>
    tpu.vector_store %arg15[%c0_66, %c48], %173 {strides = array<i32>} : memref<16x64xbf16, #tpu.memory_space<vmem>>, vector<16x16xbf16>,
    %c0_67 = arith.constant 0 : index
    %c0_68 = arith.constant 0 : index
    %175 = vector.load %arg15[%c0_67, %c0_68] : memref<16x64xbf16, #tpu.memory_space<vmem>>, vector<16x64xbf16>
    %c0_69 = arith.constant 0 : index
    %c0_70 = arith.constant 0 : index
    %176 = vector.load %arg13[%c0_69, %c0_70] : memref<64x64xbf16, #tpu.memory_space<vmem>>, vector<64x64xbf16>
    %cst_71 = arith.constant dense<0.000000e+00> : vector<16x64xf32>
    %177 = tpu.matmul %175, %176, %cst_71 {dimension_numbers = #tpu.dot_dimension_numbers<[1], [0], [0], [1], [0, 0, 1, 1], [], []>} : vector<16x64xbf16>, vector<64x64xbf16>, vector<16x64xf32> -> vector<16x64xf32>
    %178 = arith.addf %2, %177 : vector<16x64xf32>
    %179 = arith.truncf %178 : vector<16x64xf32> to vector<16x64xbf16>
    %c0_72 = arith.constant 0 : index
    %c0_73 = arith.constant 0 : index
    %c0_74 = arith.constant 0 : index
    %180 = vector.load %arg14[%c0_72, %c0_73, %c0_74] : memref<1x16x64xbf16, #tpu.memory_space<vmem>>, vector<1x16x64xbf16>
    %181 = vector.shape_cast %180 : vector<1x16x64xbf16> to vector<16x64xbf16>
    %182 = vector.shape_cast %179 : vector<16x64xbf16> to vector<1x16x64xbf16>
    tpu.vector_store %arg14[%c0_72, %c0_73, %c0_74], %182 {strides = array<i32>} : memref<1x16x64xbf16, #tpu.memory_space<vmem>>, vector<1x16x64xbf16>,
    return
  }
  func.func @transform_0(%arg0: i32) -> (i32, i32, i32) {
    %c0_i32 = arith.constant 0 : i32
    %c0_i32_0 = arith.constant 0 : i32
    %c0_i32_1 = arith.constant 0 : i32
    return %arg0, %c0_i32, %c0_i32_0 : i32, i32, i32
  }
  func.func @transform_1(%arg0: i32) -> (i32, i32) {
    %c0_i32 = arith.constant 0 : i32
    %c0_i32_0 = arith.constant 0 : i32
    %c0_i32_1 = arith.constant 0 : i32
    return %c0_i32, %c0_i32_0 : i32, i32
  }
  func.func @transform_2(%arg0: i32) -> (i32, i32) {
    %c0_i32 = arith.constant 0 : i32
    %c0_i32_0 = arith.constant 0 : i32
    %c0_i32_1 = arith.constant 0 : i32
    return %c0_i32, %c0_i32_0 : i32, i32
  }
  func.func @transform_3(%arg0: i32) -> (i32, i32) {
    %c0_i32 = arith.constant 0 : i32
    %c0_i32_0 = arith.constant 0 : i32
    %c0_i32_1 = arith.constant 0 : i32
    return %c0_i32, %c0_i32_0 : i32, i32
  }
  func.func @transform_4(%arg0: i32) -> (i32, i32) {
    %c0_i32 = arith.constant 0 : i32
    %c0_i32_0 = arith.constant 0 : i32
    %c0_i32_1 = arith.constant 0 : i32
    return %c0_i32, %c0_i32_0 : i32, i32
  }
  func.func @transform_5(%arg0: i32) -> (i32, i32) {
    %c0_i32 = arith.constant 0 : i32
    %c0_i32_0 = arith.constant 0 : i32
    %c0_i32_1 = arith.constant 0 : i32
    return %c0_i32, %c0_i32_0 : i32, i32
  }
  func.func @transform_6(%arg0: i32) -> (i32, i32) {
    %c0_i32 = arith.constant 0 : i32
    %c0_i32_0 = arith.constant 0 : i32
    %c0_i32_1 = arith.constant 0 : i32
    return %c0_i32, %c0_i32_0 : i32, i32
  }
  func.func @transform_7(%arg0: i32) -> (i32, i32) {
    %c0_i32 = arith.constant 0 : i32
    %c0_i32_0 = arith.constant 0 : i32
    %c0_i32_1 = arith.constant 0 : i32
    return %c0_i32, %c0_i32_0 : i32, i32
  }
  func.func @transform_8(%arg0: i32) -> (i32, i32) {
    %c0_i32 = arith.constant 0 : i32
    %c0_i32_0 = arith.constant 0 : i32
    %c0_i32_1 = arith.constant 0 : i32
    return %c0_i32, %c0_i32_0 : i32, i32
  }
  func.func @transform_9(%arg0: i32) -> (i32, i32) {
    %c0_i32 = arith.constant 0 : i32
    %c0_i32_0 = arith.constant 0 : i32
    %c0_i32_1 = arith.constant 0 : i32
    return %c0_i32, %c0_i32_0 : i32, i32
  }
  func.func @transform_10(%arg0: i32) -> (i32, i32) {
    %c0_i32 = arith.constant 0 : i32
    %c0_i32_0 = arith.constant 0 : i32
    %c0_i32_1 = arith.constant 0 : i32
    return %c0_i32, %c0_i32_0 : i32, i32
  }
  func.func @transform_11(%arg0: i32) -> (i32, i32) {
    %c0_i32 = arith.constant 0 : i32
    %c0_i32_0 = arith.constant 0 : i32
    %c0_i32_1 = arith.constant 0 : i32
    return %c0_i32, %c0_i32_0 : i32, i32
  }
  func.func @transform_12(%arg0: i32) -> (i32, i32) {
    %c0_i32 = arith.constant 0 : i32
    %c0_i32_0 = arith.constant 0 : i32
    %c0_i32_1 = arith.constant 0 : i32
    return %c0_i32, %c0_i32_0 : i32, i32
  }
  func.func @transform_13(%arg0: i32) -> (i32, i32, i32) {
    %c0_i32 = arith.constant 0 : i32
    %c0_i32_0 = arith.constant 0 : i32
    %c0_i32_1 = arith.constant 0 : i32
    return %arg0, %c0_i32, %c0_i32_0 : i32, i32, i32
  }
}

</mosaic_0001>

<bundles_post_ra>
// kernel: gpt_forward.9
= control target key start
LH: loop header
LB: loop body
LE: loop exit
PB: predicated region body
PF: predicated region fallthrough
CT: control target
= control target key end

     0   :  { %s1322_s0 = inlined_call_operand.vmem [shape: bf16[32,64], index: 0, kind: input, shape index: {}]   ;;  %s1323_s1 = inlined_call_operand.vmem [shape: f32[1,64], index: 1, kind: input, shape index: {}]   ;;  %s1324_s2 = inlined_call_operand.vmem [shape: f32[1,64], index: 2, kind: input, shape index: {}]   ;;  %s1325_s3 = inlined_call_operand.vmem [shape: bf16[64,1024], index: 3, kind: input, shape index: {}]   ;;  %s1326_s4 = inlined_call_operand.vmem [shape: f32[1,1024], index: 4, kind: input, shape index: {}]   ;;  %s1327_s5 = inlined_call_operand.hbm [shape: f32[32,1024], index: 5, kind: output, shape index: {}]  }
   0x1   :  { %1332 = sst [smem:[#allocation10_spill]] %s1325_s3 }
   0x2   :  { %10 = vsyncpa [#allocation5], 0 }
   0x3   :  { %12 = vsyncpa [#allocation5 + $0x1], 0  ;;  %s1073_s18 = smov 0   ;;  %s1075_s19 = smov 0  }
   0x4   :  { %s1077_s20 = smov 0   ;;  %s1079_s21 = smov 0  }
   0x5   :  { %s1081_s22 = smov 0   ;;  %s1083_s23 = smov 0  }
   0x6   :  { %s1085_s24 = smov 0   ;;  %s1087_s25 = smov 0  }
   0x7   :  { %s1089_s26 = smov 0   ;;  %s1091_s27 = smov 0  }
   0x8 LB: > { %1333 = sst [smem:[#allocation7_spill]] %s1033_s26  ;;  %s712_s28 = sadd.s32 4294967295, %s1037_s27   ;;  %s1037_s27 = sphi %s1091_s27, %s18_s27   ;;  %s1033_s26 = sphi %s1089_s26, %s1343_s26   ;;  %s1029_s25 = sphi %s1087_s25, %s1350_s25   ;;  %s1025_s24 = sphi %s1085_s24, %s1341_s24   ;;  %s1021_s23 = sphi %s1083_s23, %s1349_s23   ;;  %s1017_s22 = sphi %s1081_s22, %s1348_s22   ;;  %s1013_s21 = sphi %s1079_s21, %s1347_s21   ;;  %s1009_s20 = sphi %s1077_s20, %s1346_s20   ;;  %s1005_s19 = sphi %s1075_s19, %s1345_s19   ;;  %s1001_s18 = sphi %s1073_s18, %s1344_s18  }
   0x9   : > { %s713_s29 = sadd.s32 4294967294, %s1037_s27   ;;  %s27_s30 = sadd.s32 1, %s1029_s25 }
   0xa   : > { %s30_s6 = sadd.s32 1, %s1033_s26  ;;  %p28_p0 = scmp.ge.s32.totalorder %s27_s30, 2 }
   0xb   : > { %s105_s7 = sadd.s32 1, %s1017_s22  ;;  %p112_p1 = scmp.ne.s32.totalorder %s1017_s22, %s1013_s21 }
   0xc   : > { %p113_p2 = scmp.eq.s32.totalorder %s1037_s27, 0  ;;  %s1352_s30 = smov (%p28_p0, %s27_s30), 0 }
   0xd   : > { %1334 = sst [smem:[#allocation8_spill]] %s1352_s30  ;;  %s1354_s6 = smov (!%p28_p0, %s30_s6), %s1033_s26 }
   0xe   : > { %s102_s8 = ssub.s32 %s1029_s25, %s1352_s30  ;;  %p1136_p3 = por %p113_p2, %p112_p1 }
   0xf   : > { %p32_p4 = scmp.ge.s32.totalorder %s1354_s6, 2  ;;  %p103_p5 = scmp.eq.s32.totalorder %s102_s8, 0 }
  0x10   : > { %s159_s10 = sadd.s32 1, %s1009_s20  ;;  %p169_p6 = scmp.ne.s32.totalorder %s1009_s20, %s1005_s19 }
  0x11   : > { %s1356_s6 = smov (%p32_p4, %s1354_s6), 0  ;;  %p170_p7 = scmp.eq.s32.totalorder %s712_s28, 3 }
  0x12   : > { %1336 = sst [smem:[#allocation9_spill]] %s1356_s6  ;;  %s154_s12 = ssub.s32 %s1033_s26, %s1356_s6 }
  0x13   : > { %s1146_s11 = scalar_select %p103_p5, %s1017_s22, %s105_s7  }
  0x14   : > { %s156_s13 = sor.u32 %s154_s12, %s102_s8  ;;  %p175_p8 = scmp.ne.s32.totalorder %s1005_s19, %s1001_s18 }
  0x15   : > { %p157_p9 = scmp.eq.s32.totalorder %s156_s13, 0  ;;  %p1152_p10 = por %p170_p7, %p169_p6 }
  0x16   : > { %p176_p11 = scmp.eq.s32.totalorder %s713_s29, 3  ;;  %p715_p13 = scmp.ge.s32.totalorder %s1037_s27, 4 }
  0x17   : > { %s1157_s15 = scalar_select %p157_p9, %s1009_s20, %s159_s10  }
  0x18   : > { %p1159_p12 = por %p176_p11, %p175_p8  ;;  %198 = sbr.rel (%p715_p13) target bundleno = 55 (0x37), region = 24 }
  0x1d   : > { %210 = sbr.rel (!%p1136_p3) target bundleno = 55 (0x37), region = 32  ;;  %s212_s17 = sand.u32 (%p1136_p3), 1, %s1017_s22  }
  0x1e   : > { %s805_s28 = sshll.u32 (%p1136_p3), %s1029_s25, 4  ;;  %s716_s7 = sshll.u32 (%p1136_p3), %s212_s17, 7 }
  0x1f   : > { %s1339_s3 = sld [smem:[#allocation10_spill]] (%p1136_p3)  ;;  %s214_s9 = scalar_lea.vmem (%p1136_p3), [#allocation3], %s716_s7 }
  0x25   : > { %s1171_s29 = scalar_lea.vmem %s1339_s3, %s805_s28 }
  0x26   : > { %v230_v0 = vld [vmem:[%s1171_s29] sm:$0xff]  ;;  %v232_v1 = vld [vmem:[%s1171_s29 + $0x8] sm:$0xff] }
  0x27   : > { %v234_v2 = vld [vmem:[%s1171_s29 + $0x20] sm:$0xff]  ;;  %231 = vst [vmem:[%s214_s9] sm:$0xff] %v230_v0  ;;  %v236_v3 = vld [vmem:[%s1171_s29 + $0x28] sm:$0xff] }
  0x28   : > { %233 = vst [vmem:[%s214_s9 + $0x8] sm:$0xff] %v232_v1  ;;  %v238_v4 = vld [vmem:[%s1171_s29 + $0x40] sm:$0xff]  ;;  %v240_v5 = vld [vmem:[%s1171_s29 + $0x48] sm:$0xff] }
  0x29   : > { %235 = vst [vmem:[%s214_s9 + $0x10] sm:$0xff] %v234_v2  ;;  %v242_v6 = vld [vmem:[%s1171_s29 + $0x60] sm:$0xff]  ;;  %v244_v7 = vld [vmem:[%s1171_s29 + $0x68] sm:$0xff] }
  0x2a   : > { %237 = vst [vmem:[%s214_s9 + $0x18] sm:$0xff] %v236_v3  ;;  %v246_v8 = vld [vmem:[%s1171_s29 + $0x80] sm:$0xff]  ;;  %v248_v9 = vld [vmem:[%s1171_s29 + $0x88] sm:$0xff] }
  0x2b   : > { %239 = vst [vmem:[%s214_s9 + $0x20] sm:$0xff] %v238_v4  ;;  %v250_v10 = vld [vmem:[%s1171_s29 + $0xa0] sm:$0xff]  ;;  %v252_v11 = vld [vmem:[%s1171_s29 + $0xa8] sm:$0xff] }
  0x2c   : > { %241 = vst [vmem:[%s214_s9 + $0x28] sm:$0xff] %v240_v5  ;;  %v254_v12 = vld [vmem:[%s1171_s29 + $0xc0] sm:$0xff]  ;;  %v256_v13 = vld [vmem:[%s1171_s29 + $0xc8] sm:$0xff] }
  0x2d   : > { %243 = vst [vmem:[%s214_s9 + $0x30] sm:$0xff] %v242_v6  ;;  %v258_v14 = vld [vmem:[%s1171_s29 + $0xe0] sm:$0xff]  ;;  %v260_v15 = vld [vmem:[%s1171_s29 + $0xe8] sm:$0xff] }
  0x2e   : > { %245 = vst [vmem:[%s214_s9 + $0x38] sm:$0xff] %v244_v7 }
  0x2f   : > { %247 = vst [vmem:[%s214_s9 + $0x40] sm:$0xff] %v246_v8 }
  0x30   : > { %249 = vst [vmem:[%s214_s9 + $0x48] sm:$0xff] %v248_v9 }
  0x31   : > { %251 = vst [vmem:[%s214_s9 + $0x50] sm:$0xff] %v250_v10 }
  0x32   : > { %253 = vst [vmem:[%s214_s9 + $0x58] sm:$0xff] %v252_v11 }
  0x33   : > { %255 = vst [vmem:[%s214_s9 + $0x60] sm:$0xff] %v254_v12 }
  0x34   : > { %257 = vst [vmem:[%s214_s9 + $0x68] sm:$0xff] %v256_v13 }
  0x35   : > { %259 = vst [vmem:[%s214_s9 + $0x70] sm:$0xff] %v258_v14 }
  0x36   : > { %261 = vst [vmem:[%s214_s9 + $0x78] sm:$0xff] %v260_v15 }
  0x37 PF: > { %p719_p0 = scmp.ge.s32.totalorder %s1037_s27, 1  ;;  %p274_p1 = scmp.lt.s32.totalorder %s1037_s27, 5 }
  0x39   : > { %p275_p2 = pnand %p719_p0, %p274_p1 }
  0x3a   : > { %s281_s10 = sand.u32 (!%p275_p2), 1, %s1013_s21   ;;  %s1329_s13 = sand.u32 (!%p275_p2), 1, %s1005_s19  }
  0x3b   : > { %278 = sbr.rel (%p275_p2) target bundleno = 520 (0x208), region = 59  ;;  %s720_s17 = sshll.u32 (!%p275_p2), %s281_s10, 7 }
  0x3c   : > { %s721_s28 = sshll.u32 (!%p275_p2), %s1329_s13, 6  ;;  %s722_s7 = sshll.u32 (!%p275_p2), %s1025_s24, 1 }
  0x3d   : > { %s1197_s8 = sshll.u32 (!%p275_p2), %s1021_s23, 2  ;;  %p318_p3 = scmp.lt.s32.totalorder (!%p275_p2), %s722_s7, 3 }
  0x3e   : > { %p325_p4 = scmp.lt.s32.totalorder (!%p275_p2), %s1197_s8, 7  ;;  %s1210_s30 = scalar_lea.vmem (!%p275_p2), [#allocation3], %s720_s17 }
  0x3f   : > { %s1212_s26 = scalar_lea.vmem (!%p275_p2), [#allocation4], %s721_s28  ;;  %p725_p5 = scmp.ne.s32.totalorder (!%p275_p2), %s1021_s23, 0 }
  0x40   : > { %s1358_s7 = smov (!%p318_p3, %s722_s7), 3 }
  0x41   : > { %s1201_s12 = scalar_select %p325_p4, %s1197_s8, 7 }
  0x42   : > { %s723_s29 = sshll.u32 %s1358_s7, 2  ;;  %335 = sbr.rel (%p725_p5) target bundleno = 353 (0x161), region = 67 }
  0x43   : > { %s321_s21 = scalar_lea.vmem %s1322_s0, %s723_s29  ;;  %s327_s13 = scalar_lea.vmem %s1326_s4, %s1201_s12 }
  0x47   : > { %v825_v16 = vld [vmem:[%s321_s21] sm:$0xff]   ;;  %vm342_vm0 = vcmask 523264   ;;  %v1039_v21 = vmov 64.0   ;;  %vm406_vm6 = vcmask 519168  }
  0x48   : > { %v826_v17 = vunpack.c.l.bf16 %v825_v16  ;;  %v827_v19 = vunpack.c.h.bf16 %v825_v16  ;;  %921 = vrcp.f32 %v1039_v21  ;;  %v919_v52 = vld [vmem:[%s1323_s1] ss:$0 sm:$0xff] }
  0x49   : > { %v920_v55 = vld [vmem:[%s1324_s2] ss:$0 sm:$0xff] }
  0x4a   : > { %v343_v18 = vsel %vm342_vm0, %v826_v17, 0.0  ;;  %v346_v20 = vsel %vm342_vm0, %v827_v19, 0.0 }
  0x4b   : > { %344 = vadd.xlane.f32.xlu0 %v343_v18 }
  0x4e   : > { %v922_v22 = vpop.eup %921 }
  0x4f   : > { %v350_v23 = vmul.f32 64.0, %v922_v22  ;;  %vm354_vm1 = vweird.f32 %v922_v22 }
  0x51   : > { %v351_v24 = vsub.f32 1.0, %v350_v23 }
  0x53   : > { %347 = vadd.xlane.f32.xlu0 %v346_v20  ;;  %v352_v25 = vmul.f32 %v922_v22, %v351_v24 }
  0x55   : > { %v353_v26 = vadd.f32 %v922_v22, %v352_v25 }
  0x57   : > { %v355_v27 = vsel %vm354_vm1, %v922_v22, %v353_v26 }
  0xbe   : > { %v345_v28 = vpop.xlane.xlu0 %344 }
  0xbf   : > { %v356_v29 = vmul.f32 %v355_v27, %v345_v28 }
  0xc1   : > { %v358_v30 = vsub.f32 %v826_v17, %v356_v29 }
  0xc3   : > { %v360_v31 = vmul.f32 %v358_v30, %v358_v30 }
  0xc5   : > { %v362_v32 = vsel %vm342_vm0, %v360_v31, 0.0 }
  0xc6   : > { %363 = vadd.xlane.f32.xlu1 %v362_v32  ;;  %v348_v33 = vpop.xlane.xlu0 %347 }
  0xc7   : > { %v357_v34 = vmul.f32 %v355_v27, %v348_v33 }
  0xc9   : > { %v359_v35 = vsub.f32 %v827_v19, %v357_v34 }
  0xcb   : > { %v361_v36 = vmul.f32 %v359_v35, %v359_v35 }
  0xcd   : > { %v365_v37 = vsel %vm342_vm0, %v361_v36, 0.0 }
  0xce   : > { %366 = vadd.xlane.f32.xlu1 %v365_v37 }
 0x139   : > { %v364_v38 = vpop.xlane.xlu1 %363 }
 0x13a   : > { %v368_v39 = vmul.f32 %v364_v38, %v355_v27 }
 0x13c   : > { %v370_v40 = vadd.f32 1e-05, %v368_v39 }
 0x13e   : > { %923 = vrsqrt.f32 %v370_v40  ;;  %vm378_vm3 = vweird.f32 %v370_v40 }
 0x141   : > { %v367_v41 = vpop.xlane.xlu1 %366 }
 0x142   : > { %v369_v42 = vmul.f32 %v367_v41, %v355_v27 }
 0x144   : > { %v924_v43 = vpop.eup %923  ;;  %v371_v44 = vadd.f32 1e-05, %v369_v42 }
 0x145   : > { %v373_v45 = vmul.f32 %v924_v43, %v370_v40  ;;  %vm379_vm2 = vweird.f32 %v924_v43 }
 0x146   : > { %925 = vrsqrt.f32 %v371_v44  ;;  %vm380_vm4 = vmor %vm378_vm3, %vm379_vm2  ;;  %vm388_vm7 = vweird.f32 %v371_v44 }
 0x147   : > { %v374_v46 = vmul.f32 %v924_v43, %v373_v45 }
 0x149   : > { %v375_v47 = vmul.f32 0.5, %v374_v46 }
 0x14b   : > { %v376_v48 = vsub.f32 1.5, %v375_v47 }
 0x14c   : > { %v926_v49 = vpop.eup %925 }
 0x14d   : > { %v377_v50 = vmul.f32 %v924_v43, %v376_v48  ;;  %v383_v51 = vmul.f32 %v926_v49, %v371_v44  ;;  %vm389_vm5 = vweird.f32 %v926_v49 }
 0x14e   : > { %vm390_vm8 = vmor %vm388_vm7, %vm389_vm5 }
 0x14f   : > { %v381_v53 = vsel %vm380_vm4, %v924_v43, %v377_v50  ;;  %v384_v54 = vmul.f32 %v926_v49, %v383_v51 }
 0x150   : > { %v392_v56 = vmul.f32 %v381_v53, %v358_v30 }
 0x151   : > { %v385_v57 = vmul.f32 0.5, %v384_v54 }
 0x152   : > { %v397_v58 = vmul.f32 %v919_v52, %v392_v56 }
 0x153   : > { %v386_v59 = vsub.f32 1.5, %v385_v57 }
 0x154   : > { %v402_v60 = vadd.f32 %v920_v55, %v397_v58 }
 0x155   : > { %v387_v61 = vmul.f32 %v926_v49, %v386_v59 }
 0x156   : > { %v404_v62 = vpack.c.bf16 %v402_v60, %v402_v60 }
 0x157   : > { %v391_v63 = vsel %vm390_vm8, %v926_v49, %v387_v61 }
 0x158   : > { %407 = vst.msk [vmem:[#allocation2] sm:$0xf] %vm406_vm6, %v404_v62  ;;  %v393_v0 = vmul.f32 %v391_v63, %v359_v35 }
 0x15a   : > { %v398_v1 = vmul.f32 %v919_v52, %v393_v0 }
 0x15c   : > { %v403_v2 = vadd.f32 %v920_v55, %v398_v1 }
 0x15e   : > { %v405_v3 = vpack.c.bf16 %v403_v2, %v403_v2 }
 0x160   : > { %408 = vst.msk [vmem:[#allocation2 + $0x4] sm:$0xf] %vm406_vm6, %v405_v3 }
 0x161 PF: > { %v780_v4 = vld [vmem:[%s1210_s30 + $0x60] sm:$0xf]  ;;  %v821_v5 = vld [vmem:[%s1210_s30 + $0x6c] sm:$0xf0]  ;;  %v819_v6 = vld [vmem:[%s1210_s30 + $0x64] sm:$0xf] }
 0x162   : > { %v781_v7 = vor.u32 %v821_v5, %v780_v4  ;;  %v782_v8 = vld [vmem:[%s1210_s30 + $0x70] sm:$0xf0]  ;;  %v788_v9 = vld [vmem:[%s1210_s30 + $0x68] sm:$0xf]  ;;  %v822_v10 = vld [vmem:[%s1210_s30 + $0x74] sm:$0xf0] }
 0x163   : > { %v785_v11 = vor.u32 %v819_v6, %v782_v8  ;;  %v789_v12 = vor.u32 %v822_v10, %v788_v9  ;;  %v820_v13 = vld [vmem:[%s1210_s30 + $0x6c] sm:$0xf]  ;;  %v790_v14 = vld [vmem:[%s1210_s30 + $0x78] sm:$0xf0]  ;;  %v764_v15 = vld [vmem:[%s1210_s30 + $0x40] sm:$0xf] }
 0x164   : > { %530 = vmatpush.bf16.msra.mxu0 %v781_v7  ;;  %v793_v16 = vor.u32 %v820_v13, %v790_v14  ;;  %v817_v17 = vld [vmem:[%s1210_s30 + $0x4c] sm:$0xf0]  ;;  %v815_v18 = vld [vmem:[%s1210_s30 + $0x44] sm:$0xf]  ;;  %v766_v19 = vld [vmem:[%s1210_s30 + $0x50] sm:$0xf0] }
 0x165   : > { %544 = vmatpush.bf16.msra.mxu1 %v785_v11  ;;  %558 = vmatpush.bf16.msra.mxu2 %v789_v12  ;;  %v765_v20 = vor.u32 %v817_v17, %v764_v15  ;;  %v769_v21 = vor.u32 %v815_v18, %v766_v19  ;;  %v772_v22 = vld [vmem:[%s1210_s30 + $0x48] sm:$0xf]  ;;  %v818_v23 = vld [vmem:[%s1210_s30 + $0x54] sm:$0xf0]  ;;  %v816_v24 = vld [vmem:[%s1210_s30 + $0x4c] sm:$0xf] }
 0x166   : > { %572 = vmatpush.bf16.msra.mxu3 %v793_v16  ;;  %v773_v25 = vor.u32 %v818_v23, %v772_v22  ;;  %v774_v26 = vld [vmem:[%s1210_s30 + $0x58] sm:$0xf0]  ;;  %v748_v27 = vld [vmem:[%s1210_s30 + $0x20] sm:$0xf]  ;;  %v813_v28 = vld [vmem:[%s1210_s30 + $0x2c] sm:$0xf0] }
 0x167   : > { %v777_v29 = vor.u32 %v816_v24, %v774_v26  ;;  %v811_v30 = vld [vmem:[%s1210_s30 + $0x24] sm:$0xf]  ;;  %v750_v31 = vld [vmem:[%s1210_s30 + $0x30] sm:$0xf0]  ;;  %v756_v32 = vld [vmem:[%s1210_s30 + $0x28] sm:$0xf]  ;;  %v749_v33 = vor.u32 %v813_v28, %v748_v27 }
 0x168   : > { %531 = vmatpush.bf16.msra.mxu0 %v765_v20  ;;  %v814_v34 = vld [vmem:[%s1210_s30 + $0x34] sm:$0xf0]  ;;  %v812_v35 = vld [vmem:[%s1210_s30 + $0x2c] sm:$0xf]  ;;  %v758_v36 = vld [vmem:[%s1210_s30 + $0x38] sm:$0xf0]  ;;  %v753_v37 = vor.u32 %v811_v30, %v750_v31 }
 0x169   : > { %545 = vmatpush.bf16.msra.mxu1 %v769_v21  ;;  %559 = vmatpush.bf16.msra.mxu2 %v773_v25  ;;  %v757_v38 = vor.u32 %v814_v34, %v756_v32  ;;  %v732_v39 = vld [vmem:[%s1210_s30] sm:$0xf]  ;;  %v809_v40 = vld [vmem:[%s1210_s30 + $0xc] sm:$0xf0]  ;;  %v807_v41 = vld [vmem:[%s1210_s30 + $0x4] sm:$0xf]  ;;  %v761_v42 = vor.u32 %v812_v35, %v758_v36 }
 0x16a   : > { %573 = vmatpush.bf16.msra.mxu3 %v777_v29  ;;  %v734_v43 = vld [vmem:[%s1210_s30 + $0x10] sm:$0xf0]  ;;  %v740_v44 = vld [vmem:[%s1210_s30 + $0x8] sm:$0xf]  ;;  %v810_v45 = vld [vmem:[%s1210_s30 + $0x14] sm:$0xf0]  ;;  %v733_v48 = vor.u32 %v809_v40, %v732_v39 }
 0x16b   : > { %v808_v46 = vld [vmem:[%s1210_s30 + $0xc] sm:$0xf]  ;;  %v742_v47 = vld [vmem:[%s1210_s30 + $0x18] sm:$0xf0]  ;;  %v737_v49 = vor.u32 %v807_v41, %v734_v43  ;;  %v741_v50 = vor.u32 %v810_v45, %v740_v44  ;;  %vm522_vm9 = vcmask 523264   ;;  %s823_s7 = sshll.u32 %s1025_s24, 4 }
 0x16c   : > { %532 = vmatpush.bf16.msra.mxu0 %v749_v33  ;;  %v745_v51 = vor.u32 %v808_v46, %v742_v47  ;;  %v806_v52 = vld [vmem:[#allocation2] sm:$0xff]  ;;  %s603_s29 = sadd.s32 %s823_s7, %s1197_s8  ;;  %s606_s8 = sshll.u32 %s1212_s26, 4  ;;  %s607_s8 = int_to_ptr.vmem [resolvable:$true] %s606_s8 }
 0x16d   : > { %546 = vmatpush.bf16.msra.mxu1 %v753_v37  ;;  %560 = vmatpush.bf16.msra.mxu2 %v757_v38  ;;  %v427_v53 = vld [vmem:[%s327_s13] sm:$0xf]  ;;  %s802_s12 = sshll.u32 %s603_s29, 3  ;;  %s1340_s10 = sand.u32 1, %s1005_s19  }
 0x16e   : > { %574 = vmatpush.bf16.msra.mxu3 %v761_v42  ;;  %v429_v54 = vperm.slane %v427_v53, 0  ;;  %v430_v55 = vperm.slane %v427_v53, 1  ;;  %v431_v60 = vperm.slane %v427_v53, 2  ;;  %v432_v61 = vperm.slane %v427_v53, 3  ;;  %s605_s9 = scalar_lea.hbm %s1327_s5, %s802_s12  ;;  %s591_s3 = scalar_lea.sflag [#allocation5], %s1340_s10 }
 0x16f   : > { %s608_s21 = sshll.u32 %s605_s9, 4  ;;  %s947_s28 = scalar_lea.hbm %s1327_s5, 256  ;;  %s609_s21 = int_to_ptr.hbm [resolvable:$true] %s608_s21 }
 0x170   : > { %533 = vmatpush.bf16.msra.mxu0 %v733_v48  ;;  %s941_s23 = sshra.s32 %s609_s21, 4  ;;  %s942_s23 = int_to_ptr.hbm [resolvable:$true] %s941_s23 }
 0x171   : > { %547 = vmatpush.bf16.msra.mxu1 %v737_v49  ;;  %561 = vmatpush.bf16.msra.mxu2 %v741_v50  ;;  %s943_s6 = scalar_lea.hbm %s942_s23, 64  ;;  %p948_p9 = scmp.lt.s32.totalorder %s942_s23, %s1327_s5 }
 0x172   : > { %575 = vmatpush.bf16.msra.mxu3 %v745_v51  ;;  %p944_p6 = scmp.ne.s32.totalorder %s942_s23, %s943_s6  ;;  %p949_p11 = scmp.lt.s32.totalorder %s947_s28, %s943_s6 }
 0x173   : > { %794 = vmatmul.msk.bf16.vlgmr.msra.gmra.mxu0 %vm522_vm9, %v806_v52 }
 0x174   : > { %795 = vmatmul.msk.bf16.vlgmr.msra.gmra.mxu1 %vm522_vm9, %v806_v52  ;;  %796 = vmatmul.msk.bf16.vlgmr.msra.gmra.mxu2 %vm522_vm9, %v806_v52  ;;  %p945_p7 = pnand %p944_p6, %p1152_p10  ;;  %p950_p13 = por %p949_p11, %p948_p9 }
 0x175   : > { %797 = vmatmul.msk.bf16.vlgmr.msra.gmra.mxu3 %vm522_vm9, %v806_v52 }
 0x176   : > { %p946_p8 = pneg %p945_p7 }
 0x178   : > { %p951_p0 = pnand %p950_p13, %p946_p8 }
 0x1f0   : > { %v535_v56 = vpop.f32.mrf.mxu0 }
 0x1f1   : > { %v536_v57 = vadd.f32 %v535_v56, %v429_v54  ;;  %v549_v58 = vpop.f32.mrf.mxu1 }
 0x1f2   : > { %v550_v59 = vadd.f32 %v549_v58, %v430_v55 }
 0x1f3   : > { %582 = vst [vmem:[%s1212_s26] sm:$0xff] %v536_v57 }
 0x1f4   : > { %583 = vst [vmem:[%s1212_s26 + $0x8] sm:$0xff] %v550_v59 }
 0x1f7   : > { %v563_v62 = vpop.f32.mrf.mxu2 }
 0x1f8   : > { %v564_v63 = vadd.f32 %v563_v62, %v431_v60  ;;  %v577_v0 = vpop.f32.mrf.mxu3  ;;  %v537_v1 = vpop.f32.mrf.mxu0 }
 0x1f9   : > { %v578_v2 = vadd.f32 %v577_v0, %v432_v61  ;;  %v538_v3 = vadd.f32 %v537_v1, %v429_v54  ;;  %v551_v4 = vpop.f32.mrf.mxu1 }
 0x1fa   : > { %584 = vst [vmem:[%s1212_s26 + $0x10] sm:$0xff] %v564_v63  ;;  %v552_v5 = vadd.f32 %v551_v4, %v430_v55 }
 0x1fb   : > { %585 = vst [vmem:[%s1212_s26 + $0x18] sm:$0xff] %v578_v2 }
 0x1fc   : > { %586 = vst [vmem:[%s1212_s26 + $0x20] sm:$0xff] %v538_v3 }
 0x1fd   : > { %587 = vst [vmem:[%s1212_s26 + $0x28] sm:$0xff] %v552_v5 }
 0x1ff   : > { %v565_v6 = vpop.f32.mrf.mxu2 }
 0x200   : > { %v566_v7 = vadd.f32 %v565_v6, %v431_v60  ;;  %v579_v8 = vpop.f32.mrf.mxu3 }
 0x201   : > { %v580_v9 = vadd.f32 %v579_v8, %v432_v61 }
 0x202   : > { %588 = vst [vmem:[%s1212_s26 + $0x30] sm:$0xff] %v566_v7 }
 0x203   : > { %589 = vst [vmem:[%s1212_s26 + $0x38] sm:$0xff] %v580_v9 }
 0x204   : > { %954 = shalt.err (!%p951_p0)
}
 0x205   : > { %s1040_s26 = smov 512   ;;  %s1041_s12 = smov 1024  }
 0x206   : > { %s1042_s24 = smov 32  }
 0x207   : > { %828 = dma.vmem_to_hbm [thread:$0]  (%p1152_p10), %s607_s8, 1024, %s609_s21, %s591_s3, %s1040_s26, %s1041_s12, %s1042_s24  }
 0x208 PF: > { %p834_p1 = scmp.ge.s32.totalorder %s1037_s27, 2  ;;  %s623_s13 = sand.u32 1, %s1001_s18  }
 0x209   : > { %s624_s9 = scalar_lea.sflag [#allocation5], %s623_s13 }
 0x20a   : > { %p831_p2 = pnand %p834_p1, %p1159_p12 }
 0x20c   : > { %p832_p3 = pneg %p831_p2 }
 0x20e   : > { %996 = dma.done.wait (%p832_p3), %s624_s9, 1024  }
 0x20f   : > { %998 = vsyncadd (%p832_p3), %s624_s9, 4294966272  ;;  %s18_s27 = sadd.s32 1, %s1037_s27   ;;  %s1341_s24 = sld [smem:[#allocation7_spill]] }
 0x210   : > { %p15_p4 = scmp.ge.s32.totalorder %s18_s27, 6   ;;  %s1342_s14 = sld [smem:[#allocation8_spill]] }
 0x211   : > { %s1343_s26 = sld [smem:[#allocation9_spill]]  ;;  %s1344_s18 = smov %s1005_s19 }
 0x212   : > { %s1345_s19 = smov %s1009_s20  ;;  %s1346_s20 = smov %s1157_s15 }
 0x213   : > { %s1347_s21 = smov %s1017_s22  ;;  %s1348_s22 = smov %s1146_s11 }
 0x214   : > { %s1349_s23 = smov %s1029_s25  ;;  %17 = sbr.rel (!%p15_p4) target bundleno = 8 (0x8), region = 113 }
 0x216   : > { %s1350_s25 = smov %s1342_s14 }
 0x219   :  { %630 = vsyncpa [#allocation5], 1 }
 0x21a   :  { %632 = vsyncpa [#allocation5 + $0x1], 1 }

// kernel: gpt_forward.6
= control target key start
LH: loop header
LB: loop body
LE: loop exit
PB: predicated region body
PF: predicated region fallthrough
CT: control target
= control target key end

     0   :  { %s1296_s0 = inlined_call_operand.vmem [shape: bf16[32,64], index: 0, kind: input, shape index: {}]   ;;  %s1297_s1 = inlined_call_operand.vmem [shape: f32[1,64], index: 1, kind: input, shape index: {}]   ;;  %s1298_s2 = inlined_call_operand.vmem [shape: f32[1,64], index: 2, kind: input, shape index: {}]   ;;  %s1299_s3 = inlined_call_operand.vmem [shape: bf16[64,256], index: 3, kind: input, shape index: {}]   ;;  %s1300_s4 = inlined_call_operand.vmem [shape: f32[1,256], index: 4, kind: input, shape index: {}]   ;;  %s1301_s5 = inlined_call_operand.vmem [shape: bf16[256,64], index: 5, kind: input, shape index: {}]   ;;  %s1302_s6 = inlined_call_operand.vmem [shape: f32[1,64], index: 6, kind: input, shape index: {}]   ;;  %s1303_s7 = inlined_call_operand.vmem [shape: bf16[32,64], index: 7, kind: output, shape index: {}]  }
   0x1   :  { %1304 = sst [smem:[#allocation6_spill]] %s1299_s3 }
   0x2   :  { %s1129_s24 = smov 0   ;;  %s1131_s25 = smov 0  }
   0x3   :  { %s1133_s26 = smov 0   ;;  %s1135_s27 = smov 0  }
   0x4   :  { %s1137_s28 = smov 0   ;;  %s1139_s29 = smov 0  }
   0x5   :  { %s1141_s30 = smov 0  }
   0x6 LB: > { %s26_s8 = sadd.s32 1, %s1077_s28  ;;  %s29_s9 = sadd.s32 1, %s1081_s29  ;;  %s1085_s30 = sphi %s1141_s30, %s17_s30   ;;  %s1081_s29 = sphi %s1139_s29, %s1313_s29   ;;  %s1077_s28 = sphi %s1137_s28, %s1312_s28   ;;  %s1073_s27 = sphi %s1135_s27, %s1311_s27   ;;  %s1069_s26 = sphi %s1133_s26, %s1310_s26   ;;  %s1065_s25 = sphi %s1131_s25, %s1309_s25   ;;  %s1061_s24 = sphi %s1129_s24, %s1308_s24  }
   0x7   : > { %p27_p0 = scmp.ge.s32.totalorder %s26_s8, 2  ;;  %s104_s10 = sadd.s32 1, %s1065_s25 }
   0x8   : > { %p111_p1 = scmp.ne.s32.totalorder %s1065_s25, %s1061_s24  ;;  %p112_p2 = scmp.eq.s32.totalorder %s1085_s30, 0 }
   0x9   : > { %s1315_s8 = smov (%p27_p0, %s26_s8), 0  ;;  %s1317_s9 = smov (!%p27_p0, %s29_s9), %s1081_s29 }
   0xa   : > { %s101_s11 = ssub.s32 %s1077_s28, %s1315_s8  ;;  %p113_p3 = por %p112_p2, %p111_p1 }
   0xb   : > { %p31_p4 = scmp.ge.s32.totalorder %s1317_s9, 2  ;;  %p102_p5 = scmp.eq.s32.totalorder %s101_s11, 0 }
   0xc   : > { %p868_p6 = scmp.ge.s32.totalorder %s1085_s30, 4 }
   0xd   : > { %s1319_s9 = smov (%p31_p4, %s1317_s9), 0 }
   0xe   : > { %1305 = sst [smem:[#allocation5_spill]] %s1319_s9  ;;  %245 = sbr.rel (%p868_p6) target bundleno = 37 (0x25), region = 28 }
   0xf   : > { %s1178_s12 = scalar_select %p102_p5, %s1065_s25, %s104_s10  }
  0x13   : > { %257 = sbr.rel (!%p113_p3) target bundleno = 37 (0x25), region = 36  ;;  %s259_s13 = sand.u32 (%p113_p3), 1, %s1065_s25  }
  0x14   : > { %s870_s14 = sshll.u32 (%p113_p3), %s1077_s28, 2  ;;  %s869_s15 = sshll.u32 (%p113_p3), %s259_s13, 5 }
  0x15   : > { %s1306_s3 = sld [smem:[#allocation6_spill]] (%p113_p3)  ;;  %s261_s19 = scalar_lea.vmem (%p113_p3), [#allocation4], %s869_s15 }
  0x1b   : > { %s263_s18 = scalar_lea.vmem %s1306_s3, %s870_s14 }
  0x1c   : > { %v280_v0 = vld [vmem:[%s263_s18] sm:$0xf]  ;;  %v282_v1 = vld [vmem:[%s263_s18 + $0x8] sm:$0xf]  ;;  %v284_v2 = vld [vmem:[%s263_s18 + $0x10] sm:$0xf] }
  0x1d   : > { %281 = vst [vmem:[%s261_s19] sm:$0xf] %v280_v0  ;;  %v286_v3 = vld [vmem:[%s263_s18 + $0x18] sm:$0xf]  ;;  %v288_v4 = vld [vmem:[%s263_s18 + $0x20] sm:$0xf] }
  0x1e   : > { %283 = vst [vmem:[%s261_s19 + $0x4] sm:$0xf] %v282_v1  ;;  %v290_v5 = vld [vmem:[%s263_s18 + $0x28] sm:$0xf]  ;;  %v292_v6 = vld [vmem:[%s263_s18 + $0x30] sm:$0xf] }
  0x1f   : > { %285 = vst [vmem:[%s261_s19 + $0x8] sm:$0xf] %v284_v2  ;;  %v294_v7 = vld [vmem:[%s263_s18 + $0x38] sm:$0xf] }
  0x20   : > { %287 = vst [vmem:[%s261_s19 + $0xc] sm:$0xf] %v286_v3 }
  0x21   : > { %289 = vst [vmem:[%s261_s19 + $0x10] sm:$0xf] %v288_v4 }
  0x22   : > { %291 = vst [vmem:[%s261_s19 + $0x14] sm:$0xf] %v290_v5 }
  0x23   : > { %293 = vst [vmem:[%s261_s19 + $0x18] sm:$0xf] %v292_v6 }
  0x24   : > { %295 = vst [vmem:[%s261_s19 + $0x1c] sm:$0xf] %v294_v7 }
  0x25 PF: > { %p871_p7 = scmp.ge.s32.totalorder %s1085_s30, 1  ;;  %p349_p8 = scmp.lt.s32.totalorder %s1085_s30, 5 }
  0x27   : > { %p350_p9 = pnand %p871_p7, %p349_p8 }
  0x28   : > { %s356_s20 = sand.u32 (!%p350_p9), 1, %s1061_s24   ;;  %s873_s21 = sshll.u32 (!%p350_p9), %s1073_s27, 1 }
  0x29   : > { %353 = sbr.rel (%p350_p9) target bundleno = 694 (0x2b6), region = 85  ;;  %s872_s22 = sshll.u32 (!%p350_p9), %s356_s20, 5 }
  0x2a   : > { %p401_p10 = scmp.lt.s32.totalorder (!%p350_p9), %s873_s21, 3  ;;  %p406_p11 = scmp.lt.s32.totalorder (!%p350_p9), %s1069_s26, 1 }
  0x2b   : > { %s875_s11 = sshll.u32 (!%p350_p9), %s1069_s26, 4  ;;  %s1214_s13 = scalar_lea.vmem (!%p350_p9), [#allocation4], %s872_s22 }
  0x2c   : > { %p410_p12 = scmp.lt.s32.totalorder (!%p350_p9), %s875_s11, 31  ;;  %p879_p13 = scmp.ne.s32.totalorder (!%p350_p9), %s1069_s26, 0 }
  0x2e   : > { %s1321_s21 = smov (!%p401_p10, %s873_s21), 3  ;;  %s1323_s11 = smov (!%p410_p12, %s875_s11), 31 }
  0x2f   : > { %s1192_s23 = scalar_select %p406_p11, %s1069_s26, 1 }
  0x30   : > { %s874_s10 = sshll.u32 %s1321_s21, 2  ;;  %s876_s20 = sshll.u32 %s1323_s11, 2 }
  0x31   : > { %s1198_s15 = scalar_lea.vmem %s1296_s0, %s874_s10  ;;  %s408_s18 = scalar_lea.vmem %s1300_s4, %s1192_s23 }
  0x32   : > { %s1207_s19 = scalar_lea.vmem %s1303_s7, %s874_s10  ;;  %s1212_s9 = scalar_lea.vmem %s1301_s5, %s876_s20 }
  0x33   : > { %425 = sbr.rel (%p879_p13) target bundleno = 338 (0x152), region = 93 }
  0x38   : > { %v952_v8 = vld [vmem:[%s1198_s15] sm:$0xff]   ;;  %vm432_vm0 = vcmask 523264   ;;  %v1087_v10 = vmov 0.0   ;;  %v1088_v14 = vmov 64.0   ;;  %vm496_vm6 = vcmask 519168  }
  0x39   : > { %v953_v9 = vunpack.c.l.bf16 %v952_v8  ;;  %499 = vst.msk [vmem:[#allocation3] sm:$0xff] %vm432_vm0, %v1087_v10  ;;  %v954_v12 = vunpack.c.h.bf16 %v952_v8  ;;  %1019 = vrcp.f32 %v1088_v14  ;;  %v1017_v45 = vld [vmem:[%s1297_s1] ss:$0 sm:$0xff] }
  0x3a   : > { %500 = vst.msk [vmem:[#allocation3 + $0x8] sm:$0xff] %vm432_vm0, %v1087_v10  ;;  %v1018_v48 = vld [vmem:[%s1298_s2] ss:$0 sm:$0xff] }
  0x3b   : > { %v433_v11 = vsel %vm432_vm0, %v953_v9, 0.0  ;;  %v436_v13 = vsel %vm432_vm0, %v954_v12, 0.0 }
  0x3c   : > { %434 = vadd.xlane.f32.xlu0 %v433_v11 }
  0x3f   : > { %v1020_v15 = vpop.eup %1019 }
  0x40   : > { %v440_v16 = vmul.f32 64.0, %v1020_v15  ;;  %vm444_vm1 = vweird.f32 %v1020_v15 }
  0x42   : > { %v441_v17 = vsub.f32 1.0, %v440_v16 }
  0x44   : > { %437 = vadd.xlane.f32.xlu0 %v436_v13  ;;  %v442_v18 = vmul.f32 %v1020_v15, %v441_v17 }
  0x46   : > { %v443_v19 = vadd.f32 %v1020_v15, %v442_v18 }
  0x48   : > { %v445_v20 = vsel %vm444_vm1, %v1020_v15, %v443_v19 }
  0xaf   : > { %v435_v21 = vpop.xlane.xlu0 %434 }
  0xb0   : > { %v446_v22 = vmul.f32 %v445_v20, %v435_v21 }
  0xb2   : > { %v448_v23 = vsub.f32 %v953_v9, %v446_v22 }
  0xb4   : > { %v450_v24 = vmul.f32 %v448_v23, %v448_v23 }
  0xb6   : > { %v452_v25 = vsel %vm432_vm0, %v450_v24, 0.0 }
  0xb7   : > { %453 = vadd.xlane.f32.xlu1 %v452_v25  ;;  %v438_v26 = vpop.xlane.xlu0 %437 }
  0xb8   : > { %v447_v27 = vmul.f32 %v445_v20, %v438_v26 }
  0xba   : > { %v449_v28 = vsub.f32 %v954_v12, %v447_v27 }
  0xbc   : > { %v451_v29 = vmul.f32 %v449_v28, %v449_v28 }
  0xbe   : > { %v455_v30 = vsel %vm432_vm0, %v451_v29, 0.0 }
  0xbf   : > { %456 = vadd.xlane.f32.xlu1 %v455_v30 }
 0x12a   : > { %v454_v31 = vpop.xlane.xlu1 %453 }
 0x12b   : > { %v458_v32 = vmul.f32 %v454_v31, %v445_v20 }
 0x12d   : > { %v460_v33 = vadd.f32 1e-05, %v458_v32 }
 0x12f   : > { %1021 = vrsqrt.f32 %v460_v33  ;;  %vm468_vm3 = vweird.f32 %v460_v33 }
 0x132   : > { %v457_v34 = vpop.xlane.xlu1 %456 }
 0x133   : > { %v459_v35 = vmul.f32 %v457_v34, %v445_v20 }
 0x135   : > { %v1022_v36 = vpop.eup %1021  ;;  %v461_v37 = vadd.f32 1e-05, %v459_v35 }
 0x136   : > { %v463_v38 = vmul.f32 %v1022_v36, %v460_v33  ;;  %vm469_vm2 = vweird.f32 %v1022_v36 }
 0x137   : > { %1023 = vrsqrt.f32 %v461_v37  ;;  %vm470_vm4 = vmor %vm468_vm3, %vm469_vm2  ;;  %vm478_vm7 = vweird.f32 %v461_v37 }
 0x138   : > { %v464_v39 = vmul.f32 %v1022_v36, %v463_v38 }
 0x13a   : > { %v465_v40 = vmul.f32 0.5, %v464_v39 }
 0x13c   : > { %v466_v41 = vsub.f32 1.5, %v465_v40 }
 0x13d   : > { %v1024_v42 = vpop.eup %1023 }
 0x13e   : > { %v467_v43 = vmul.f32 %v1022_v36, %v466_v41  ;;  %v473_v44 = vmul.f32 %v1024_v42, %v461_v37  ;;  %vm479_vm5 = vweird.f32 %v1024_v42 }
 0x13f   : > { %vm480_vm8 = vmor %vm478_vm7, %vm479_vm5 }
 0x140   : > { %v471_v46 = vsel %vm470_vm4, %v1022_v36, %v467_v43  ;;  %v474_v47 = vmul.f32 %v1024_v42, %v473_v44 }
 0x141   : > { %v482_v49 = vmul.f32 %v471_v46, %v448_v23 }
 0x142   : > { %v475_v50 = vmul.f32 0.5, %v474_v47 }
 0x143   : > { %v487_v51 = vmul.f32 %v1017_v45, %v482_v49 }
 0x144   : > { %v476_v52 = vsub.f32 1.5, %v475_v50 }
 0x145   : > { %v492_v53 = vadd.f32 %v1018_v48, %v487_v51 }
 0x146   : > { %v477_v54 = vmul.f32 %v1024_v42, %v476_v52 }
 0x147   : > { %v494_v55 = vpack.c.bf16 %v492_v53, %v492_v53 }
 0x148   : > { %v481_v56 = vsel %vm480_vm8, %v1024_v42, %v477_v54 }
 0x149   : > { %497 = vst.msk [vmem:[#allocation2] sm:$0xf] %vm496_vm6, %v494_v55  ;;  %v483_v57 = vmul.f32 %v481_v56, %v449_v28 }
 0x14b   : > { %v488_v58 = vmul.f32 %v1017_v45, %v483_v57 }
 0x14d   : > { %v493_v59 = vadd.f32 %v1018_v48, %v488_v58 }
 0x14f   : > { %v495_v60 = vpack.c.bf16 %v493_v59, %v493_v59 }
 0x151   : > { %498 = vst.msk [vmem:[#allocation2 + $0x4] sm:$0xf] %vm496_vm6, %v495_v60 }
 0x152 PF: > { %v942_v61 = vld [vmem:[%s1214_s13 + $0x18] sm:$0xff]  ;;  %v941_v62 = vld [vmem:[%s1214_s13 + $0x10] sm:$0xff]  ;;  %v940_v63 = vld [vmem:[%s1214_s13 + $0x8] sm:$0xff]  ;;  %vm544_vm9 = vcmask 523264   ;;  %p935_p0 = scmp.ne.s32.totalorder %s1069_s26, 1 }
 0x153   : > { %552 = vmatpush.bf16.msra.mxu0 %v942_v61  ;;  %v939_v0 = vld [vmem:[%s1214_s13] sm:$0xff]  ;;  %v1025_v2 = vld [vmem:[%s408_s18] ss:$0 sm:$0xff]  ;;  %v949_v7 = vld [vmem:[%s1212_s9 + $0x30] sm:$0xff] }
 0x154   : > { %v950_v3 = vld [vmem:[%s1212_s9 + $0x38] sm:$0xff]  ;;  %v948_v9 = vld [vmem:[%s1212_s9 + $0x28] sm:$0xff]  ;;  %v947_v14 = vld [vmem:[%s1212_s9 + $0x20] sm:$0xff] }
 0x155   : > { %717 = vmatpush.bf16.msra.mxu1 %v950_v3  ;;  %v946_v20 = vld [vmem:[%s1212_s9 + $0x18] sm:$0xff]  ;;  %v945_v26 = vld [vmem:[%s1212_s9 + $0x10] sm:$0xff]  ;;  %v944_v34 = vld [vmem:[%s1212_s9 + $0x8] sm:$0xff] }
 0x156   : > { %v943_v41 = vld [vmem:[%s1212_s9] sm:$0xff] }
 0x157   : > { %553 = vmatpush.bf16.msra.mxu0 %v941_v62 }
 0x158   : > { %v938_v1 = vld [vmem:[#allocation2] sm:$0xff] }
 0x159   : > { %718 = vmatpush.bf16.msra.mxu1 %v949_v7 }
 0x15b   : > { %554 = vmatpush.bf16.msra.mxu0 %v940_v63 }
 0x15d   : > { %719 = vmatpush.bf16.msra.mxu1 %v948_v9 }
 0x15f   : > { %555 = vmatpush.bf16.msra.mxu0 %v939_v0 }
 0x161   : > { %720 = vmatpush.bf16.msra.mxu1 %v947_v14 }
 0x162   : > { %900 = vmatmul.msk.bf16.vlgmr.msra.gmra.mxu0 %vm544_vm9, %v938_v1 }
 0x165   : > { %721 = vmatpush.bf16.msra.mxu1 %v946_v20 }
 0x169   : > { %722 = vmatpush.bf16.msra.mxu1 %v945_v26 }
 0x16d   : > { %723 = vmatpush.bf16.msra.mxu1 %v944_v34 }
 0x171   : > { %724 = vmatpush.bf16.msra.mxu1 %v943_v41 }
 0x1df   : > { %v557_v4 = vpop.f32.mrf.mxu0 }
 0x1e0   : > { %v1241_v5 = vadd.f32 %v1025_v2, %v557_v4 }
 0x1e2   : > { %v1244_v6 = vmul.f32 0.70710677, %v1241_v5 }
 0x1e4   : > { %v566_v8 = vmul.f32 %v1244_v6, %v1244_v6 }
 0x1e6   : > { %v567_v10 = vmin.f32 %v566_v8, 16.0 }
 0x1e7   : > { %v559_v11 = vpop.f32.mrf.mxu0 }
 0x1e8   : > { %v568_v12 = vmul.f32 2.1237322e-06, %v567_v10  ;;  %v1250_v13 = vadd.f32 %v1025_v2, %v559_v11  ;;  %v579_v15 = vmul.f32 3.8918573e-05, %v567_v10 }
 0x1ea   : > { %v569_v16 = vadd.f32 0.00028619796, %v568_v12  ;;  %v1254_v17 = vmul.f32 0.70710677, %v1250_v13  ;;  %v580_v18 = vadd.f32 0.001143296, %v579_v15 }
 0x1ec   : > { %v606_v19 = vmul.f32 %v1254_v17, %v1254_v17  ;;  %v570_v21 = vmul.f32 %v569_v16, %v567_v10  ;;  %v581_v22 = vmul.f32 %v580_v18, %v567_v10 }
 0x1ee   : > { %v607_v23 = vmin.f32 %v606_v19, 16.0  ;;  %v582_v24 = vadd.f32 0.014752088, %v581_v22  ;;  %v571_v28 = vadd.f32 0.0036580483, %v570_v21 }
 0x1f0   : > { %v608_v25 = vmul.f32 2.1237322e-06, %v607_v23  ;;  %v619_v27 = vmul.f32 3.8918573e-05, %v607_v23  ;;  %v583_v29 = vmul.f32 %v582_v24, %v567_v10  ;;  %v572_v36 = vmul.f32 %v571_v28, %v567_v10 }
 0x1f1   : > { %v563_v28 = vmul.f32 0.5, %v1250_v13 }
 0x1f2   : > { %v609_v30 = vadd.f32 0.00028619796, %v608_v25  ;;  %v620_v31 = vadd.f32 0.001143296, %v619_v27  ;;  %v584_v32 = vadd.f32 0.112945676, %v583_v29 }
 0x1f3   : > { %v573_v43 = vadd.f32 0.05243302, %v572_v36  ;;  %v562_v27 = vmul.f32 0.5, %v1241_v5 }
 0x1f4   : > { %v610_v33 = vmul.f32 %v609_v30, %v607_v23  ;;  %v621_v35 = vmul.f32 %v620_v31, %v607_v23  ;;  %v585_v37 = vmul.f32 %v584_v32, %v567_v10 }
 0x1f5   : > { %v574_v49 = vmul.f32 %v573_v43, %v567_v10 }
 0x1f6   : > { %v611_v38 = vadd.f32 0.0036580483, %v610_v33  ;;  %v622_v39 = vadd.f32 0.014752088, %v621_v35  ;;  %v586_v40 = vadd.f32 0.4994258, %v585_v37 }
 0x1f7   : > { %v575_v53 = vadd.f32 0.18741608, %v574_v49  ;;  %v650_v33 = vld [vmem:[#allocation3] sm:$0xff] }
 0x1f8   : > { %v623_v42 = vmul.f32 %v622_v39, %v607_v23  ;;  %v587_v44 = vmul.f32 %v586_v40, %v567_v10  ;;  %v612_v45 = vmul.f32 %v611_v38, %v607_v23 }
 0x1f9   : > { %v576_v58 = vmul.f32 %v575_v53, %v567_v10 }
 0x1fa   : > { %v624_v46 = vadd.f32 0.112945676, %v623_v42  ;;  %v588_v47 = vadd.f32 1.0, %v587_v44  ;;  %v613_v50 = vadd.f32 0.05243302, %v612_v45 }
 0x1fb   : > { %v577_v0 = vadd.f32 1.1283791, %v576_v58 }
 0x1fc   : > { %v625_v48 = vmul.f32 %v624_v46, %v607_v23  ;;  %1026 = vrcp.f32 %v588_v47  ;;  %v614_v54 = vmul.f32 %v613_v50, %v607_v23  ;;  %v600_v61 = vand.u32 2147483648, %v588_v47 }
 0x1fd   : > { %v598_v63 = vand.u32 2147483647, %v588_v47  ;;  %vm594_vm11 = vweird.f32 %v588_v47  ;;  %v578_v9 = vmul.f32 %v577_v0, %v1244_v6 }
 0x1fe   : > { %v626_v51 = vadd.f32 0.4994258, %v625_v48  ;;  %v615_v59 = vadd.f32 0.18741608, %v614_v54  ;;  %v601_v4 = vor.u32 1.1754944e-38, %v600_v61 }
 0x1ff   : > { %vm599_vm13 = vcmp.eq.f32.partialorder %v598_v63, 8.507059e+37 }
 0x200   : > { %v627_v52 = vmul.f32 %v626_v51, %v607_v23  ;;  %v616_v2 = vmul.f32 %v615_v59, %v607_v23 }
 0x202   : > { %v628_v55 = vadd.f32 1.0, %v627_v52  ;;  %v1027_v56 = vpop.eup %1026  ;;  %v617_v12 = vadd.f32 1.1283791, %v616_v2 }
 0x203   : > { %v590_v57 = vmul.f32 %v1027_v56, %v588_v47  ;;  %vm595_vm10 = vweird.f32 %v1027_v56 }
 0x204   : > { %1028 = vrcp.f32 %v628_v55  ;;  %vm596_vm12 = vmor %vm594_vm11, %vm595_vm10  ;;  %v640_v14 = vand.u32 2147483648, %v628_v55  ;;  %v638_v18 = vand.u32 2147483647, %v628_v55  ;;  %vm634_vm15 = vweird.f32 %v628_v55 }
 0x205   : > { %v591_v60 = vsub.f32 1.0, %v590_v57  ;;  %v618_v21 = vmul.f32 %v617_v12, %v1254_v17  ;;  %v651_v17 = vld [vmem:[#allocation3 + $0x8] sm:$0xff] }
 0x206   : > { %v641_v20 = vor.u32 1.1754944e-38, %v640_v14  ;;  %vm639_vm1 = vcmp.eq.f32.partialorder %v638_v18, 8.507059e+37 }
 0x207   : > { %v592_v62 = vmul.f32 %v1027_v56, %v591_v60 }
 0x209   : > { %v593_v3 = vadd.f32 %v1027_v56, %v592_v62 }
 0x20a   : > { %v1029_v1 = vpop.eup %1028 }
 0x20b   : > { %v630_v7 = vmul.f32 %v1029_v1, %v628_v55  ;;  %v597_v8 = vsel %vm596_vm12, %v1027_v56, %v593_v3  ;;  %vm635_vm14 = vweird.f32 %v1029_v1 }
 0x20c   : > { %v602_v11 = vsel %vm599_vm13, %v601_v4, %v597_v8  ;;  %vm636_vm0 = vmor %vm634_vm15, %vm635_vm14 }
 0x20d   : > { %v631_v10 = vsub.f32 1.0, %v630_v7  ;;  %v603_v15 = vmul.f32 %v602_v11, %v578_v9 }
 0x20f   : > { %v632_v16 = vmul.f32 %v1029_v1, %v631_v10  ;;  %v901_v22 = vclamps-f32 %v603_v15, 1.0 }
 0x211   : > { %v633_v19 = vadd.f32 %v1029_v1, %v632_v16  ;;  %v646_v26 = vadd.f32 1.0, %v901_v22 }
 0x213   : > { %v637_v23 = vsel %vm636_vm0, %v1029_v1, %v633_v19  ;;  %v648_v30 = vmul.f32 %v646_v26, %v562_v27 }
 0x214   : > { %v642_v24 = vsel %vm639_vm1, %v641_v20, %v637_v23 }
 0x215   : > { %v643_v25 = vmul.f32 %v642_v24, %v618_v21 }
 0x217   : > { %v902_v6 = vclamps-f32 %v643_v25, 1.0 }
 0x219   : > { %v647_v29 = vadd.f32 1.0, %v902_v6 }
 0x21b   : > { %v649_v31 = vmul.f32 %v647_v29, %v563_v28 }
 0x21d   : > { %v652_v32 = vpack.c.bf16 %v649_v31, %v648_v30 }
 0x21f   : > { %725 = vmatmul.bf16.vlgmr.msra.gmra.mxu1 %v652_v32 }
 0x29c   : > { %v726_v34 = vpop.f32.mrf.mxu1 }
 0x29d   : > { %v731_v35 = vadd.f32 %v726_v34, %v650_v33 }
 0x29f   : > { %733 = vst.msk [vmem:[#allocation3] sm:$0xff] %vm544_vm9, %v731_v35 }
 0x2a3   : > { %738 = sbr.rel (%p935_p0) target bundleno = 694 (0x2b6), region = 97 }
 0x2a4   : > { %v728_v36 = vpop.f32.mrf.mxu1 }
 0x2a5   : > { %v732_v37 = vadd.f32 %v728_v36, %v651_v17 }
 0x2a7   : > { %734 = vst.msk [vmem:[#allocation3 + $0x8] sm:$0xff] %vm544_vm9, %v732_v37 }
 0x2a8   : > { %v956_v5 = vld [vmem:[%s1198_s15] sm:$0xff]   ;;  %v743_v13 = vld [vmem:[#allocation3] sm:$0xff]  ;;  %vm755_vm2 = vcmask 519168  }
 0x2a9   : > { %v957_v38 = vunpack.c.l.bf16 %v956_v5  ;;  %v958_v39 = vunpack.c.h.bf16 %v956_v5  ;;  %v1030_v40 = vld [vmem:[%s1302_s6] ss:$0 sm:$0xff] }
 0x2ab   : > { %v745_v42 = vadd.f32 %v957_v38, %v743_v13 }
 0x2ad   : > { %v751_v44 = vadd.f32 %v1030_v40, %v745_v42 }
 0x2ae   : > { %v744_v41 = vld [vmem:[#allocation3 + $0x8] sm:$0xff] }
 0x2af   : > { %v746_v43 = vadd.f32 %v958_v39, %v744_v41  ;;  %v753_v46 = vpack.c.bf16 %v751_v44, %v751_v44 }
 0x2b1   : > { %v752_v45 = vadd.f32 %v1030_v40, %v746_v43  ;;  %756 = vst.msk [vmem:[%s1207_s19] sm:$0xf] %vm755_vm2, %v753_v46 }
 0x2b3   : > { %v754_v47 = vpack.c.bf16 %v752_v45, %v752_v45 }
 0x2b5   : > { %757 = vst.msk [vmem:[%s1207_s19 + $0x4] sm:$0xf] %vm755_vm2, %v754_v47 }
 0x2b6 PF: > { %s17_s30 = sadd.s32 1, %s1085_s30   ;;  %s1307_s15 = sld [smem:[#allocation5_spill]] }
 0x2b7   : > { %p14_p1 = scmp.ge.s32.totalorder %s17_s30, 6   ;;  %s1308_s24 = smov %s1065_s25 }
 0x2b8   : > { %s1309_s25 = smov %s1178_s12  ;;  %s1310_s26 = smov %s1077_s28 }
 0x2b9   : > { %s1311_s27 = smov %s1081_s29  ;;  %s1312_s28 = smov %s1315_s8 }
 0x2ba   :  { %16 = sbr.rel (!%p14_p1) target bundleno = 6 (0x6), region = 141 }
 0x2bc   : > { %s1313_s29 = smov %s1307_s15 }

// kernel: gpt_forward.5
= control target key start
LH: loop header
LB: loop body
LE: loop exit
PB: predicated region body
PF: predicated region fallthrough
CT: control target
= control target key end

     0   :  { %s1565_s25 = smov 0   ;;  %s1756_s0 = inlined_call_operand.vmem [shape: bf16[2,16,64], index: 0, kind: input, shape index: {}]   ;;  %s1757_s1 = inlined_call_operand.vmem [shape: f32[1,64], index: 1, kind: input, shape index: {}]   ;;  %s1758_s2 = inlined_call_operand.vmem [shape: f32[1,64], index: 2, kind: input, shape index: {}]   ;;  %s1759_s3 = inlined_call_operand.vmem [shape: bf16[64,32], index: 3, kind: input, shape index: {}]   ;;  %s1760_s4 = inlined_call_operand.vmem [shape: f32[1,32], index: 4, kind: input, shape index: {}]   ;;  %s1761_s5 = inlined_call_operand.vmem [shape: f32[1,32], index: 5, kind: input, shape index: {}]   ;;  %s1762_s6 = inlined_call_operand.vmem [shape: bf16[32,64], index: 6, kind: input, shape index: {}]   ;;  %s1763_s7 = inlined_call_operand.vmem [shape: bf16[64,32], index: 7, kind: input, shape index: {}]   ;;  %s1764_s8 = inlined_call_operand.vmem [shape: f32[1,32], index: 8, kind: input, shape index: {}]   ;;  %s1765_s9 = inlined_call_operand.vmem [shape: f32[1,32], index: 9, kind: input, shape index: {}]   ;;  %s1766_s10 = inlined_call_operand.vmem [shape: bf16[32,64], index: 10, kind: input, shape index: {}]   ;;  %s1767_s11 = inlined_call_operand.vmem [shape: bf16[32,64], index: 11, kind: input, shape index: {}]   ;;  %s1768_s12 = inlined_call_operand.vmem [shape: bf16[64,64], index: 12, kind: input, shape index: {}]   ;;  %s1769_s13 = inlined_call_operand.vmem [shape: bf16[2,16,64], index: 13, kind: output, shape index: {}]  }
   0x1 LB: > { %s1281_s26 = sadd.s32 4294967295, %s1484_s25   ;;  %p1285_p0 = scmp.ge.s32.totalorder %s1484_s25, 1  ;;  %s1484_s25 = sphi %s1565_s25, %s23_s25  }
   0x2   : > { %p387_p1 = scmp.lt.s32.totalorder %s1484_s25, 3 }
   0x4   : > { %p388_p2 = pnand %p1285_p0, %p387_p1 }
   0x5   : > { %p431_p3 = scmp.lt.s32.totalorder (!%p388_p2), %s1281_s26, 1  ;;  %s1488_s29 = smov (!%p388_p2), 112  }
   0x6   : > { %391 = sbr.rel (%p388_p2) target bundleno = 1793 (0x701), region = 72  ;;  %s1490_s14 = smov (!%p388_p2), 80  }
   0x7   : > { %s1492_s15 = smov (!%p388_p2), 16   ;;  %s1493_s16 = smov (!%p388_p2), 32  }
   0x8   : > { %s1494_s17 = smov (!%p388_p2), 48  }
   0xb   : > { %s1771_s26 = smov (!%p431_p3, %s1281_s26), 1  ;;  %vm448_vm0 = vcmask 523264   ;;  %v1486_v5 = vmov 64.0   ;;  %v1387_v22 = vld [vmem:[%s1759_s3 + $0x18] sm:$0xff]  ;;  %v1386_v24 = vld [vmem:[%s1759_s3 + $0x10] sm:$0xff]  ;;  %v1385_v26 = vld [vmem:[%s1759_s3 + $0x8] sm:$0xff] }
   0xc   : > { %s1382_s27 = sshll.u32 %s1771_s26, 3  ;;  %1430 = vrcp.f32 %v1486_v5  ;;  %v1393_v23 = vld [vmem:[%s1763_s7 + $0x18] sm:$0xff]  ;;  %550 = vmatpush.bf16.msra.mxu0 %v1387_v22  ;;  %v1392_v25 = vld [vmem:[%s1763_s7 + $0x10] sm:$0xff]  ;;  %v1391_v27 = vld [vmem:[%s1763_s7 + $0x8] sm:$0xff]  ;;  %vm562_vm8 = vcmask 261120   ;;  %v1487_v5 = vmov 32.0  }
   0xd   : > { %s435_s30 = scalar_lea.vmem %s1756_s0, %s1382_s27  ;;  %698 = vmatpush.bf16.msra.mxu2 %v1393_v23  ;;  %v1384_v29 = vld [vmem:[%s1759_s3] sm:$0xff] }
   0xe   : > { %v1404_v0 = vld [vmem:[%s435_s30] sm:$0xff]   ;;  %s1489_s30 = smov 96  }
   0xf   : > { %v1581_v1 = vunpack.c.l.bf16 %v1404_v0  ;;  %v1585_v3 = vunpack.c.h.bf16 %v1404_v0  ;;  %v1390_v30 = vld [vmem:[%s1763_s7] sm:$0xff] }
  0x10   : > { %551 = vmatpush.bf16.msra.mxu0 %v1386_v24  ;;  %v1424_v49 = vld [vmem:[%s1757_s1] ss:$0 sm:$0xff] }
  0x11   : > { %v449_v2 = vsel %vm448_vm0, %v1581_v1, 0.0  ;;  %v452_v4 = vsel %vm448_vm0, %v1585_v3, 0.0  ;;  %699 = vmatpush.bf16.msra.mxu2 %v1392_v25  ;;  %v1425_v54 = vld [vmem:[%s1758_s2] ss:$0 sm:$0xff] }
  0x12   : > { %450 = vadd.xlane.f32.xlu0 %v449_v2  ;;  %v1431_v6 = vpop.eup %1430 }
  0x13   : > { %v456_v7 = vmul.f32 64.0, %v1431_v6  ;;  %vm460_vm1 = vweird.f32 %v1431_v6 }
  0x14   : > { %552 = vmatpush.bf16.msra.mxu0 %v1385_v26 }
  0x15   : > { %v457_v8 = vsub.f32 1.0, %v456_v7  ;;  %700 = vmatpush.bf16.msra.mxu2 %v1391_v27 }
  0x17   : > { %v458_v9 = vmul.f32 %v1431_v6, %v457_v8 }
  0x18   : > { %553 = vmatpush.bf16.msra.mxu0 %v1384_v29 }
  0x19   : > { %v459_v10 = vadd.f32 %v1431_v6, %v458_v9  ;;  %701 = vmatpush.bf16.msra.mxu2 %v1390_v30 }
  0x1a   : > { %453 = vadd.xlane.f32.xlu0 %v452_v4 }
  0x1b   : > { %v461_v11 = vsel %vm460_vm1, %v1431_v6, %v459_v10 }
  0x85   : > { %v451_v12 = vpop.xlane.xlu0 %450 }
  0x86   : > { %v462_v13 = vmul.f32 %v461_v11, %v451_v12 }
  0x88   : > { %v464_v14 = vsub.f32 %v1581_v1, %v462_v13 }
  0x8a   : > { %v466_v15 = vmul.f32 %v464_v14, %v464_v14 }
  0x8c   : > { %v468_v16 = vsel %vm448_vm0, %v466_v15, 0.0 }
  0x8d   : > { %469 = vadd.xlane.f32.xlu1 %v468_v16  ;;  %v454_v17 = vpop.xlane.xlu0 %453 }
  0x8e   : > { %v463_v18 = vmul.f32 %v461_v11, %v454_v17 }
  0x90   : > { %v465_v19 = vsub.f32 %v1585_v3, %v463_v18 }
  0x92   : > { %v467_v20 = vmul.f32 %v465_v19, %v465_v19 }
  0x94   : > { %v471_v21 = vsel %vm448_vm0, %v467_v20, 0.0 }
  0x95   : > { %472 = vadd.xlane.f32.xlu1 %v471_v21 }
 0x100   : > { %v470_v28 = vpop.xlane.xlu1 %469 }
 0x101   : > { %v474_v31 = vmul.f32 %v470_v28, %v461_v11 }
 0x103   : > { %v476_v32 = vadd.f32 1e-05, %v474_v31 }
 0x105   : > { %1432 = vrsqrt.f32 %v476_v32  ;;  %vm484_vm3 = vweird.f32 %v476_v32 }
 0x108   : > { %v473_v33 = vpop.xlane.xlu1 %472 }
 0x109   : > { %v475_v34 = vmul.f32 %v473_v33, %v461_v11 }
 0x10b   : > { %v1433_v35 = vpop.eup %1432  ;;  %v477_v36 = vadd.f32 1e-05, %v475_v34 }
 0x10c   : > { %v479_v37 = vmul.f32 %v1433_v35, %v476_v32  ;;  %vm485_vm2 = vweird.f32 %v1433_v35 }
 0x10d   : > { %1434 = vrsqrt.f32 %v477_v36  ;;  %vm486_vm4 = vmor %vm484_vm3, %vm485_vm2  ;;  %vm494_vm6 = vweird.f32 %v477_v36 }
 0x10e   : > { %v480_v38 = vmul.f32 %v1433_v35, %v479_v37  ;;  %1436 = vrcp.f32 %v1487_v5 }
 0x110   : > { %v481_v39 = vmul.f32 0.5, %v480_v38 }
 0x112   : > { %v482_v40 = vsub.f32 1.5, %v481_v39  ;;  %v1388_v39 = vld [vmem:[%s1762_s6] sm:$0xff] }
 0x113   : > { %v1435_v41 = vpop.eup %1434 }
 0x114   : > { %v483_v42 = vmul.f32 %v1433_v35, %v482_v40  ;;  %v489_v43 = vmul.f32 %v1435_v41, %v477_v36  ;;  %vm495_vm5 = vweird.f32 %v1435_v41  ;;  %v1437_v6 = vpop.eup %1436  ;;  %v1395_v36 = vld [vmem:[%s1766_s10 + $0x8] sm:$0xff]  ;;  %v1394_v40 = vld [vmem:[%s1766_s10] sm:$0xff] }
 0x115   : > { %vm496_vm7 = vmor %vm494_vm6, %vm495_vm5  ;;  %v570_v7 = vmul.f32 32.0, %v1437_v6  ;;  %vm574_vm9 = vweird.f32 %v1437_v6  ;;  %790 = vmatpush.bf16.msra.mxu3 %v1395_v36 }
 0x116   : > { %v490_v44 = vmul.f32 %v1435_v41, %v489_v43  ;;  %v487_v45 = vsel %vm486_vm4, %v1433_v35, %v483_v42  ;;  %v1389_v35 = vld [vmem:[%s1762_s6 + $0x8] sm:$0xff] }
 0x117   : > { %v498_v48 = vmul.f32 %v487_v45, %v464_v14  ;;  %v571_v8 = vsub.f32 1.0, %v570_v7  ;;  %650 = vmatpush.bf16.msra.mxu1 %v1389_v35 }
 0x118   : > { %v491_v46 = vmul.f32 0.5, %v490_v44 }
 0x119   : > { %v503_v53 = vmul.f32 %v1424_v49, %v498_v48  ;;  %v572_v9 = vmul.f32 %v1437_v6, %v571_v8  ;;  %791 = vmatpush.bf16.msra.mxu3 %v1394_v40 }
 0x11a   : > { %v492_v47 = vsub.f32 1.5, %v491_v46  ;;  %v1397_v46 = vld [vmem:[%s1767_s11 + $0x8] sm:$0xff] }
 0x11b   : > { %v508_v56 = vadd.f32 %v1425_v54, %v503_v53  ;;  %v573_v10 = vadd.f32 %v1437_v6, %v572_v9  ;;  %651 = vmatpush.bf16.msra.mxu1 %v1388_v39 }
 0x11c   : > { %v493_v50 = vmul.f32 %v1435_v41, %v492_v47 }
 0x11d   : > { %v575_v11 = vsel %vm574_vm9, %v1437_v6, %v573_v10 }
 0x11e   : > { %v497_v51 = vsel %vm496_vm7, %v1435_v41, %v493_v50  ;;  %v1396_v50 = vld [vmem:[%s1767_s11] sm:$0xff]  ;;  %vm851_vm7 = vcmask 130048  }
 0x11f   : > { %v499_v52 = vmul.f32 %v497_v51, %v465_v19  ;;  %822 = vmatpush.bf16.msrb.mxu1 %v1397_v46 }
 0x121   : > { %v504_v55 = vmul.f32 %v1424_v49, %v499_v52 }
 0x123   : > { %v509_v57 = vadd.f32 %v1425_v54, %v504_v55  ;;  %823 = vmatpush.bf16.msrb.mxu1 %v1396_v50 }
 0x125   : > { %v510_v58 = vpack.c.bf16 %v509_v57, %v508_v56 }
 0x127   : > { %1306 = vmatmul.msk.bf16.vlgmr.msra.gmra.mxu0 %vm448_vm0, %v510_v58  ;;  %1332 = vmatmul.msk.bf16.vlgmr.msra.gmra.mxu2 %vm448_vm0, %v510_v58 }
 0x1a4   : > { %v555_v59 = vpop.f32.mrf.mxu0 }
 0x1a5   : > { %v563_v60 = vsel %vm562_vm8, %v555_v59, 0.0 }
 0x1a6   : > { %564 = vadd.xlane.f32.xlu0 %v563_v60 }
 0x1aa   : > { %v703_v61 = vpop.f32.mrf.mxu2 }
 0x1ab   : > { %v710_v62 = vsel %vm562_vm8, %v703_v61, 0.0 }
 0x1ac   : > { %711 = vadd.xlane.f32.xlu2 %v710_v62  ;;  %v557_v63 = vpop.f32.mrf.mxu0 }
 0x1ad   : > { %v566_v0 = vsel %vm562_vm8, %v557_v63, 0.0 }
 0x1ae   : > { %567 = vadd.xlane.f32.xlu1 %v566_v0 }
 0x1b2   : > { %v705_v2 = vpop.f32.mrf.mxu2 }
 0x1b3   : > { %v713_v4 = vsel %vm562_vm8, %v705_v2, 0.0 }
 0x1b4   : > { %714 = vadd.xlane.f32.xlu2 %v713_v4 }
 0x219   : > { %v565_v12 = vpop.xlane.xlu0 %564 }
 0x21a   : > { %v576_v13 = vmul.f32 %v575_v11, %v565_v12 }
 0x21c   : > { %v1629_v14 = vsub.f32 %v555_v59, %v576_v13  ;;  %v1428_v13 = vld [vmem:[%s1764_s8] ss:$0 sm:$0xff] }
 0x21e   : > { %v580_v15 = vmul.f32 %v1629_v14, %v1629_v14 }
 0x21f   : > { %v712_v16 = vpop.xlane.xlu2 %711 }
 0x220   : > { %v716_v17 = vmul.f32 %v712_v16, %v575_v11  ;;  %v582_v18 = vsel %vm562_vm8, %v580_v15, 0.0 }
 0x221   : > { %583 = vadd.xlane.f32.xlu1 %v582_v18  ;;  %v568_v19 = vpop.xlane.xlu1 %567 }
 0x222   : > { %v1634_v20 = vsub.f32 %v703_v61, %v716_v17  ;;  %v577_v21 = vmul.f32 %v575_v11, %v568_v19  ;;  %v1426_v17 = vld [vmem:[%s1760_s4] ss:$0 sm:$0xff] }
 0x224   : > { %v720_v22 = vmul.f32 %v1634_v20, %v1634_v20  ;;  %v1638_v23 = vsub.f32 %v557_v63, %v577_v21 }
 0x226   : > { %v722_v24 = vsel %vm562_vm8, %v720_v22, 0.0  ;;  %v581_v28 = vmul.f32 %v1638_v23, %v1638_v23 }
 0x227   : > { %723 = vadd.xlane.f32.xlu2 %v722_v24  ;;  %v715_v25 = vpop.xlane.xlu2 %714  ;;  %v1429_v24 = vld [vmem:[%s1765_s9] ss:$0 sm:$0xff] }
 0x228   : > { %v717_v26 = vmul.f32 %v715_v25, %v575_v11  ;;  %v585_v31 = vsel %vm562_vm8, %v581_v28, 0.0 }
 0x22a   : > { %v1641_v27 = vsub.f32 %v705_v2, %v717_v26  ;;  %v1427_v26 = vld [vmem:[%s1761_s5] ss:$0 sm:$0xff] }
 0x22c   : > { %v721_v29 = vmul.f32 %v1641_v27, %v1641_v27 }
 0x22e   : > { %v725_v30 = vsel %vm562_vm8, %v721_v29, 0.0 }
 0x22f   : > { %726 = vadd.xlane.f32.xlu0 %v725_v30  ;;  %586 = vadd.xlane.f32.xlu2 %v585_v31 }
 0x294   : > { %v584_v32 = vpop.xlane.xlu1 %583 }
 0x295   : > { %v588_v33 = vmul.f32 %v584_v32, %v575_v11 }
 0x297   : > { %v590_v34 = vadd.f32 1e-05, %v588_v33 }
 0x299   : > { %1438 = vrsqrt.f32 %v590_v34  ;;  %vm598_vm13 = vweird.f32 %v590_v34 }
 0x29a   : > { %v724_v37 = vpop.xlane.xlu2 %723 }
 0x29b   : > { %v728_v38 = vmul.f32 %v724_v37, %v575_v11 }
 0x29d   : > { %v730_v41 = vadd.f32 1e-05, %v728_v38 }
 0x29f   : > { %v1439_v42 = vpop.eup %1438  ;;  %1440 = vrsqrt.f32 %v730_v41  ;;  %vm738_vm12 = vweird.f32 %v730_v41 }
 0x2a0   : > { %v593_v43 = vmul.f32 %v1439_v42, %v590_v34  ;;  %vm599_vm11 = vweird.f32 %v1439_v42 }
 0x2a1   : > { %vm600_vm15 = vmor %vm598_vm13, %vm599_vm11  ;;  %vm1000_vm11 = vcmask 257152   ;;  %vm1160_vm13 = vcmask 519552  }
 0x2a2   : > { %v727_v44 = vpop.xlane.xlu0 %726  ;;  %v587_v45 = vpop.xlane.xlu2 %586  ;;  %v594_v47 = vmul.f32 %v1439_v42, %v593_v43 }
 0x2a3   : > { %v729_v48 = vmul.f32 %v727_v44, %v575_v11  ;;  %v589_v49 = vmul.f32 %v587_v45, %v575_v11 }
 0x2a4   : > { %v595_v55 = vmul.f32 0.5, %v594_v47 }
 0x2a5   : > { %v1441_v51 = vpop.eup %1440  ;;  %v731_v52 = vadd.f32 1e-05, %v729_v48  ;;  %v591_v53 = vadd.f32 1e-05, %v589_v49 }
 0x2a6   : > { %v733_v54 = vmul.f32 %v1441_v51, %v730_v41  ;;  %v596_v58 = vsub.f32 1.5, %v595_v55  ;;  %vm739_vm10 = vweird.f32 %v1441_v51 }
 0x2a7   : > { %1442 = vrsqrt.f32 %v731_v52  ;;  %vm740_vm14 = vmor %vm738_vm12, %vm739_vm10  ;;  %vm748_vm3 = vweird.f32 %v731_v52  ;;  %vm608_vm5 = vweird.f32 %v591_v53  ;;  %vm920_vm10 = vcmask 125952  }
 0x2a8   : > { %v734_v56 = vmul.f32 %v1441_v51, %v733_v54  ;;  %1444 = vrsqrt.f32 %v591_v53  ;;  %v597_v0 = vmul.f32 %v1439_v42, %v596_v58  ;;  %vm1080_vm12 = vcmask 388352  }
 0x2aa   : > { %v735_v57 = vmul.f32 0.5, %v734_v56  ;;  %v601_v8 = vsel %vm600_vm15, %v1439_v42, %v597_v0 }
 0x2ab   : > { %v612_v15 = vmul.f32 %v601_v8, %v1629_v14  ;;  %v1491_v8 = vmov -1e+30  }
 0x2ac   : > { %v736_v59 = vsub.f32 1.5, %v735_v57 }
 0x2ad   : > { %v1443_v60 = vpop.eup %1442  ;;  %v617_v25 = vmul.f32 %v1426_v17, %v612_v15 }
 0x2ae   : > { %v1445_v61 = vpop.eup %1444  ;;  %v737_v62 = vmul.f32 %v1441_v51, %v736_v59  ;;  %v743_v63 = vmul.f32 %v1443_v60, %v731_v52  ;;  %vm749_vm1 = vweird.f32 %v1443_v60 }
 0x2af   : > { %v603_v2 = vmul.f32 %v1445_v61, %v591_v53  ;;  %vm609_vm2 = vweird.f32 %v1445_v61  ;;  %vm750_vm4 = vmor %vm748_vm3, %vm749_vm1  ;;  %v622_v32 = vadd.f32 %v1427_v26, %v617_v25 }
 0x2b0   : > { %v744_v4 = vmul.f32 %v1443_v60, %v743_v63  ;;  %v741_v6 = vsel %vm740_vm14, %v1441_v51, %v737_v62  ;;  %vm610_vm6 = vmor %vm608_vm5, %vm609_vm2  ;;  %vm1223_vm14 = vcmask 519168  }
 0x2b1   : > { %v604_v5 = vmul.f32 %v1445_v61, %v603_v2  ;;  %v752_v11 = vmul.f32 %v741_v6, %v1634_v20 }
 0x2b2   : > { %v745_v7 = vmul.f32 0.5, %v744_v4  ;;  %v832_v4 = vlaneseq }
 0x2b3   : > { %v605_v9 = vmul.f32 0.5, %v604_v5  ;;  %v757_v22 = vmul.f32 %v1428_v13, %v752_v11 }
 0x2b4   : > { %v746_v10 = vsub.f32 1.5, %v745_v7  ;;  %v833_v5 = vshrl.u32 %v832_v4, 7  ;;  %v836_v6 = vand.u32 127, %v832_v4 }
 0x2b5   : > { %v606_v12 = vsub.f32 1.5, %v605_v9  ;;  %v762_v30 = vadd.f32 %v1429_v24, %v757_v22 }
 0x2b6   : > { %v747_v16 = vmul.f32 %v1443_v60, %v746_v10  ;;  %v834_v10 = vadd.s32 8, %v833_v5 }
 0x2b7   : > { %v607_v18 = vmul.f32 %v1445_v61, %v606_v12 }
 0x2b8   : > { %v751_v19 = vsel %vm750_vm4, %v1443_v60, %v747_v16  ;;  %vm838_vm9 = vcmp.le.s32.totalorder %v836_v6, %v834_v10 }
 0x2b9   : > { %v753_v20 = vmul.f32 %v751_v19, %v1641_v27  ;;  %v611_v21 = vsel %vm610_vm6, %v1445_v61, %v607_v18  ;;  %v840_v15 = vsel %vm838_vm9, 0.0, %v1491_v8 }
 0x2ba   : > { %v613_v14 = vmul.f32 %v611_v21, %v1638_v23 }
 0x2bb   : > { %v758_v28 = vmul.f32 %v1428_v13, %v753_v20 }
 0x2bc   : > { %v618_v29 = vmul.f32 %v1426_v17, %v613_v14 }
 0x2bd   : > { %v763_v31 = vadd.f32 %v1429_v24, %v758_v28 }
 0x2be   : > { %v623_v33 = vadd.f32 %v1427_v26, %v618_v29 }
 0x2bf   : > { %v764_v27 = vpack.c.bf16 %v763_v31, %v762_v30 }
 0x2c0   : > { %v624_v34 = vpack.c.bf16 %v623_v33, %v622_v32 }
 0x2c1   : > { %1341 = vmatmul.msk.bf16.vlgmr.msra.gmra.mxu3 %vm562_vm8, %v764_v27 }
 0x2c2   : > { %1315 = vmatmul.msk.bf16.vlgmr.msra.gmra.mxu1 %vm562_vm8, %v624_v34 }
 0x2d2   : > { %1350 = vmatmul.msk.bf16.vlgmr.msrb.gmra.mxu1 %vm562_vm8, %v764_v27  ;;  %vm837_vm8 = vcmp.le.s32.totalorder %v836_v6, %v833_v5 }
 0x2d3   : > { %v839_v9 = vsel %vm837_vm8, 0.0, %v1491_v8 }
 0x33f   : > { %v653_v23 = vpop.f32.mrf.mxu1 }
 0x340   : > { %v658_v35 = vmul.f32 0.25, %v653_v23 }
 0x342   : > { %v660_v38 = vpack.c.bf16 %v658_v35, %v658_v35 }
 0x344   : > { %v793_v36 = vpop.f32.mrf.mxu3  ;;  %v843_v42 = vunpack.c.l.b16 %v660_v38 }
 0x345   : > { %v798_v41 = vpack.c.bf16 %v793_v36, %v793_v36 }
 0x347   : > { %v655_v37 = vpop.f32.mrf.mxu1  ;;  %v848_v47 = vunpack.c.l.b16 %v798_v41 }
 0x348   : > { %v659_v39 = vmul.f32 0.25, %v655_v37 }
 0x34a   : > { %v661_v40 = vpack.c.bf16 %v659_v39, %v659_v39 }
 0x34c   : > { %v844_v43 = vunpack.c.l.b16 %v661_v40  ;;  %v795_v44 = vpop.f32.mrf.mxu3 }
 0x34d   : > { %v799_v45 = vpack.c.bf16 %v795_v44, %v795_v44 }
 0x34e   : > { %v845_v46 = vpack.c.b16 %v844_v43, %v843_v42 }
 0x34f   : > { %v849_v48 = vunpack.c.l.b16 %v799_v45  ;;  %v825_v49 = vpop.f32.mrf.mxu1 }
 0x350   : > { %923 = vrot.lane.b32.xlu1 %v845_v46, %s1488_s29  ;;  %v830_v52 = vpack.c.bf16 %v825_v49, %v825_v49 }
 0x351   : > { %v850_v50 = vpack.c.b16 %v849_v48, %v848_v47 }
 0x352   : > { %v897_v55 = vunpack.c.l.b16 %v830_v52 }
 0x353   : > { %925 = vrot.lane.b32.xlu0 %v850_v50, %s1488_s29  ;;  %1005 = vrot.lane.b32.xlu2 %v850_v50, %s1489_s30  ;;  %v856_v51 = vsel %vm851_vm7, %v850_v50, 0 }
 0x354   : > { %865 = vmatpush.bf16.xpose.msrb.mxu3 %v856_v51 }
 0x357   : > { %v827_v53 = vpop.f32.mrf.mxu1 }
 0x358   : > { %v831_v54 = vpack.c.bf16 %v827_v53, %v827_v53  ;;  %1083 = vrot.lane.b32.xlu1 %v845_v46, %s1490_s14 }
 0x35a   : > { %v898_v56 = vunpack.c.l.b16 %v831_v54 }
 0x35b   : > { %1085 = vrot.lane.b32.xlu0 %v850_v50, %s1490_s14  ;;  %1003 = vrot.lane.b32.xlu2 %v845_v46, %s1489_s30 }
 0x35c   : > { %v1693_v57 = vpack.c.b16 %v898_v56, %v897_v55  ;;  %1351 = vmatmul.msk.bf16.vlgmr.msrb.gmra.mxu3 %vm851_vm7, %v845_v46 }
 0x35e   : > { %911 = vmatpush.bf16.msrb.mxu0 %v1693_v57 }
 0x3ad   : > { %v1006_v58 = vpop.permute.xlu2 %1005 }
 0x3ae   : > { %v1011_v59 = vsel %vm851_vm7, %v1006_v58, 0 }
 0x3af   : > { %1020 = vmatpush.bf16.xpose.msra.mxu3 %v1011_v59 }
 0x3b5   : > { %v1004_v60 = vpop.permute.xlu2 %1003 }
 0x3b6   : > { %1355 = vmatmul.msk.bf16.vlgmr.msra.gmra.mxu3 %vm851_vm7, %v1004_v60 }
 0x3c2   : > { %v924_v63 = vpop.permute.xlu1 %923 }
 0x3c5   : > { %v926_v61 = vpop.permute.xlu0 %925 }
 0x3c6   : > { %v931_v62 = vsel %vm851_vm7, %v926_v61, 0 }
 0x3c7   : > { %940 = vmatpush.bf16.xpose.msrb.mxu2 %v931_v62 }
 0x3ca   : > { %v1084_v7 = vpop.permute.xlu1 %1083 }
 0x3cd   : > { %v1086_v0 = vpop.permute.xlu0 %1085 }
 0x3ce   : > { %v1091_v2 = vsel %vm851_vm7, %v1086_v0, 0  ;;  %1353 = vmatmul.msk.bf16.vlgmr.msrb.gmra.mxu2 %vm851_vm7, %v924_v63 }
 0x3cf   : > { %1100 = vmatpush.bf16.xpose.msra.mxu2 %v1091_v2 }
 0x3de   : > { %1357 = vmatmul.msk.bf16.vlgmr.msra.gmra.mxu2 %vm851_vm7, %v1084_v7 }
 0x3df   : > { %v867_v11 = vpop.f32.mrf.mxu3 }
 0x3e0   : > { %v868_v12 = vadd.f32 %v867_v11, %v839_v9 }
 0x3e2   : > { %v872_v13 = vsel %vm851_vm7, %v868_v12, -inf }
 0x3e3   : > { %873 = vmax.xlane.f32.xlu0 %v872_v13 }
 0x3e7   : > { %v869_v16 = vpop.f32.mrf.mxu3 }
 0x3e8   : > { %v870_v17 = vadd.f32 %v869_v16, %v840_v15 }
 0x3ea   : > { %v875_v18 = vsel %vm851_vm7, %v870_v17, -inf }
 0x3eb   : > { %876 = vmax.xlane.f32.xlu2 %v875_v18 }
 0x439   : > { %v1022_v19 = vpop.f32.mrf.mxu3 }
 0x43a   : > { %v1023_v20 = vadd.f32 %v1022_v19, %v839_v9 }
 0x43c   : > { %v1027_v21 = vsel %vm851_vm7, %v1023_v20, -inf }
 0x43d   : > { %1028 = vmax.xlane.f32.xlu2 %v1027_v21 }
 0x441   : > { %v1024_v25 = vpop.f32.mrf.mxu3 }
 0x442   : > { %v1025_v29 = vadd.f32 %v1024_v25, %v840_v15 }
 0x444   : > { %v1030_v33 = vsel %vm851_vm7, %v1025_v29, -inf }
 0x451   : > { %v942_v22 = vpop.f32.mrf.mxu2 }
 0x452   : > { %v943_v24 = vadd.f32 %v942_v22, %v839_v9 }
 0x454   : > { %v947_v14 = vsel %vm851_vm7, %v943_v24, -inf }
 0x455   : > { %948 = vmax.xlane.f32.xlu1 %v947_v14 }
 0x456   : > { %v874_v26 = vpop.xlane.xlu0 %873 }
 0x457   : > { %v878_v28 = vsub.f32 %v868_v12, %v874_v26 }
 0x459   : > { %v880_v30 = vmul.f32 1.442695, %v878_v28  ;;  %v944_v31 = vpop.f32.mrf.mxu2 }
 0x45a   : > { %v945_v32 = vadd.f32 %v944_v31, %v840_v15 }
 0x45b   : > { %1446 = vpow2.f32 %v880_v30 }
 0x45c   : > { %v950_v27 = vsel %vm851_vm7, %v945_v32, -inf }
 0x45d   : > { %1031 = vmax.xlane.f32.xlu1 %v1030_v33  ;;  %951 = vmax.xlane.f32.xlu0 %v950_v27 }
 0x45e   : > { %v877_v41 = vpop.xlane.xlu2 %876 }
 0x45f   : > { %v879_v42 = vsub.f32 %v870_v17, %v877_v41 }
 0x461   : > { %v1709_v34 = vpop.eup %1446  ;;  %v1102_v23 = vpop.f32.mrf.mxu2  ;;  %v882_v43 = vmul.f32 1.442695, %v879_v42 }
 0x462   : > { %v1103_v35 = vadd.f32 %v1102_v23, %v839_v9  ;;  %v884_v37 = vsel %vm851_vm7, %v1709_v34, 0.0 }
 0x463   : > { %1448 = vpow2.f32 %v882_v43 }
 0x464   : > { %v1107_v36 = vsel %vm851_vm7, %v1103_v35, -inf }
 0x465   : > { %1108 = vmax.xlane.f32.xlu0 %v1107_v36  ;;  %885 = vadd.xlane.f32.xlu1 %v884_v37 }
 0x469   : > { %v1104_v38 = vpop.f32.mrf.mxu2  ;;  %v1449_v44 = vpop.eup %1448 }
 0x46a   : > { %v1105_v39 = vadd.f32 %v1104_v38, %v840_v15  ;;  %v887_v45 = vsel %vm851_vm7, %v1449_v44, 0.0 }
 0x46c   : > { %v1110_v40 = vsel %vm851_vm7, %v1105_v39, -inf }
 0x46d   : > { %1111 = vmax.xlane.f32.xlu2 %v1110_v40 }
 0x479   : > { %970 = vrot.lane.b32.xlu0 %v1693_v57, %s1488_s29 }
 0x4a3   : > { %888 = vadd.xlane.f32.xlu0 %v887_v45 }
 0x4b0   : > { %v1029_v46 = vpop.xlane.xlu2 %1028 }
 0x4b1   : > { %v1033_v49 = vsub.f32 %v1023_v20, %v1029_v46 }
 0x4b3   : > { %v1035_v51 = vmul.f32 1.442695, %v1033_v49 }
 0x4b7   : > { %1130 = vrot.lane.b32.xlu0 %v1693_v57, %s1490_s14  ;;  %s440_s14 = scalar_lea.vmem %s1769_s13, %s1382_s27 }
 0x4c8   : > { %v949_v47 = vpop.xlane.xlu1 %948 }
 0x4c9   : > { %v953_v48 = vsub.f32 %v943_v24, %v949_v47 }
 0x4cb   : > { %v955_v50 = vmul.f32 1.442695, %v953_v48 }
 0x4cd   : > { %1450 = vpow2.f32 %v955_v50 }
 0x4ce   : > { %1452 = vpow2.f32 %v1035_v51 }
 0x4d0   : > { %v952_v52 = vpop.xlane.xlu0 %951  ;;  %v1032_v53 = vpop.xlane.xlu1 %1031 }
 0x4d1   : > { %v954_v54 = vsub.f32 %v945_v32, %v952_v52  ;;  %v1034_v58 = vsub.f32 %v1025_v29, %v1032_v53 }
 0x4d3   : > { %v1451_v55 = vpop.eup %1450  ;;  %v957_v56 = vmul.f32 1.442695, %v954_v54  ;;  %v1037_v60 = vmul.f32 1.442695, %v1034_v58 }
 0x4d4   : > { %v959_v59 = vsel %vm851_vm7, %v1451_v55, 0.0  ;;  %v1453_v62 = vpop.eup %1452 }
 0x4d5   : > { %960 = vadd.xlane.f32.xlu2 %v959_v59  ;;  %1454 = vpow2.f32 %v957_v56  ;;  %v1039_v4 = vsel %vm851_vm7, %v1453_v62, 0.0 }
 0x4d6   : > { %1456 = vpow2.f32 %v1037_v60 }
 0x4d8   : > { %v1109_v61 = vpop.xlane.xlu0 %1108  ;;  %v886_v17 = vpop.xlane.xlu1 %885 }
 0x4d9   : > { %v1113_v63 = vsub.f32 %v1103_v35, %v1109_v61 }
 0x4db   : > { %v1115_v0 = vmul.f32 1.442695, %v1113_v63  ;;  %v1455_v2 = vpop.eup %1454  ;;  %v1401_v63 = vld [vmem:[%s1768_s12 + $0x10] sm:$0xff] }
 0x4dc   : > { %v962_v5 = vsel %vm851_vm7, %v1455_v2, 0.0  ;;  %v1457_v8 = vpop.eup %1456 }
 0x4dd   : > { %1458 = vpow2.f32 %v1115_v0  ;;  %1040 = vadd.xlane.f32.xlu2 %v1039_v4  ;;  %963 = vadd.xlane.f32.xlu1 %v962_v5  ;;  %v1042_v12 = vsel %vm851_vm7, %v1457_v8, 0.0  ;;  %v1400_v0 = vld [vmem:[%s1768_s12 + $0x8] sm:$0xff] }
 0x4e0   : > { %v1112_v6 = vpop.xlane.xlu2 %1111 }
 0x4e1   : > { %v1114_v7 = vsub.f32 %v1105_v39, %v1112_v6 }
 0x4e3   : > { %v1459_v9 = vpop.eup %1458  ;;  %v1117_v10 = vmul.f32 1.442695, %v1114_v7 }
 0x4e4   : > { %v1119_v11 = vsel %vm851_vm7, %v1459_v9, 0.0 }
 0x4e5   : > { %1460 = vpow2.f32 %v1117_v10  ;;  %1120 = vadd.xlane.f32.xlu2 %v1119_v11  ;;  %1043 = vadd.xlane.f32.xlu1 %v1042_v12 }
 0x4e6   : > { %1462 = vrcp.f32 %v886_v17 }
 0x4eb   : > { %v1461_v13 = vpop.eup %1460  ;;  %v971_v15 = vpop.permute.xlu0 %970 }
 0x4ec   : > { %983 = vmatpush.bf16.msra.mxu1 %v971_v15  ;;  %v1122_v16 = vsel %vm851_vm7, %v1461_v13, 0.0  ;;  %v1463_v19 = vpop.eup %1462 }
 0x4ed   : > { %1123 = vadd.xlane.f32.xlu1 %v1122_v16  ;;  %v892_v21 = vmul.f32 %v1463_v19, %v1709_v34 }
 0x4fd   : > { %1050 = vrot.lane.b32.xlu2 %v1693_v57, %s1489_s30 }
 0x516   : > { %v889_v18 = vpop.xlane.xlu0 %888 }
 0x517   : > { %1464 = vrcp.f32 %v889_v18 }
 0x51d   : > { %v1465_v20 = vpop.eup %1464 }
 0x51e   : > { %v893_v22 = vmul.f32 %v1465_v20, %v1449_v44 }
 0x520   : > { %v894_v24 = vpack.c.bf16 %v893_v22, %v892_v21 }
 0x522   : > { %1352 = vmatmul.msk.bf16.vlgmr.msrb.gmra.mxu0 %vm851_vm7, %v894_v24 }
 0x529   : > { %v1131_v14 = vpop.permute.xlu0 %1130 }
 0x52a   : > { %1143 = vmatpush.bf16.msrb.mxu1 %v1131_v14 }
 0x548   : > { %v961_v25 = vpop.xlane.xlu2 %960 }
 0x549   : > { %1466 = vrcp.f32 %v961_v25 }
 0x54f   : > { %v1467_v57 = vpop.eup %1466 }
 0x550   : > { %v1041_v26 = vpop.xlane.xlu2 %1040  ;;  %v964_v28 = vpop.xlane.xlu1 %963  ;;  %v967_v31 = vmul.f32 %v1467_v57, %v1451_v55 }
 0x551   : > { %1468 = vrcp.f32 %v964_v28 }
 0x552   : > { %1470 = vrcp.f32 %v1041_v26 }
 0x557   : > { %v1469_v29 = vpop.eup %1468 }
 0x558   : > { %v1121_v30 = vpop.xlane.xlu2 %1120  ;;  %v968_v32 = vmul.f32 %v1469_v29, %v1455_v2  ;;  %v1044_v33 = vpop.xlane.xlu1 %1043  ;;  %v1399_v2 = vld [vmem:[%s1768_s12] sm:$0xff] }
 0x559   : > { %1472 = vrcp.f32 %v1044_v33  ;;  %v1471_v34 = vpop.eup %1470 }
 0x55a   : > { %v969_v27 = vpack.c.bf16 %v968_v32, %v967_v31  ;;  %1474 = vrcp.f32 %v1121_v30  ;;  %v1047_v36 = vmul.f32 %v1471_v34, %v1453_v62  ;;  %v1402_v62 = vld [vmem:[%s1768_s12 + $0x18] sm:$0xff] }
 0x55b   : > { %1209 = vmatpush.bf16.msrb.mxu3 %v1402_v62 }
 0x55c   : > { %1354 = vmatmul.msk.bf16.vlgmr.msra.gmra.mxu1 %vm851_vm7, %v969_v27 }
 0x55f   : > { %v1473_v23 = vpop.eup %1472  ;;  %1210 = vmatpush.bf16.msrb.mxu3 %v1401_v63 }
 0x560   : > { %v1051_v35 = vpop.permute.xlu2 %1050  ;;  %v1048_v37 = vmul.f32 %v1473_v23, %v1457_v8  ;;  %v1124_v38 = vpop.xlane.xlu1 %1123 }
 0x561   : > { %1063 = vmatpush.bf16.msra.mxu0 %v1051_v35  ;;  %1476 = vrcp.f32 %v1124_v38  ;;  %v1475_v40 = vpop.eup %1474 }
 0x562   : > { %v1049_v39 = vpack.c.bf16 %v1048_v37, %v1047_v36  ;;  %v1127_v42 = vmul.f32 %v1475_v40, %v1459_v9 }
 0x563   : > { %1211 = vmatpush.bf16.msrb.mxu3 %v1400_v0 }
 0x564   : > { %1356 = vmatmul.msk.bf16.vlgmr.msra.gmra.mxu0 %vm851_vm7, %v1049_v39 }
 0x567   : > { %v1477_v41 = vpop.eup %1476  ;;  %1212 = vmatpush.bf16.msrb.mxu3 %v1399_v2 }
 0x568   : > { %v1128_v43 = vmul.f32 %v1477_v41, %v1461_v13 }
 0x56a   : > { %v1129_v44 = vpack.c.bf16 %v1128_v43, %v1127_v42 }
 0x56c   : > { %1358 = vmatmul.msk.bf16.vlgmr.msrb.gmra.mxu1 %vm851_vm7, %v1129_v44 }
 0x59f   : > { %v913_v45 = vpop.f32.mrf.mxu0 }
 0x5a0   : > { %v918_v46 = vpack.c.bf16 %v913_v45, %v913_v45 }
 0x5a2   : > { %921 = vst.msk [vmem:[#allocation2] sm:$0xf] %vm920_vm10, %v918_v46 }
 0x5a7   : > { %v915_v47 = vpop.f32.mrf.mxu0 }
 0x5a8   : > { %v919_v48 = vpack.c.bf16 %v915_v47, %v915_v47 }
 0x5aa   : > { %922 = vst.msk [vmem:[#allocation2 + $0x4] sm:$0xf] %vm920_vm10, %v919_v48 }
 0x5d9   : > { %v985_v49 = vpop.f32.mrf.mxu1 }
 0x5da   : > { %v990_v50 = vpack.c.bf16 %v985_v49, %v985_v49 }
 0x5dc   : > { %994 = vrot.lane.b32.xlu1 %v990_v50, %s1492_s15 }
 0x5e1   : > { %v987_v51 = vpop.f32.mrf.mxu1  ;;  %v1065_v52 = vpop.f32.mrf.mxu0 }
 0x5e2   : > { %v1070_v53 = vpack.c.bf16 %v1065_v52, %v1065_v52  ;;  %v991_v56 = vpack.c.bf16 %v987_v51, %v987_v51 }
 0x5e4   : > { %1074 = vrot.lane.b32.xlu0 %v1070_v53, %s1493_s16 }
 0x5e9   : > { %v1067_v54 = vpop.f32.mrf.mxu0  ;;  %v1145_v55 = vpop.f32.mrf.mxu1 }
 0x5ea   : > { %v1071_v58 = vpack.c.bf16 %v1067_v54, %v1067_v54  ;;  %v1150_v60 = vpack.c.bf16 %v1145_v55, %v1145_v55 }
 0x5ec   : > { %996 = vrot.lane.b32.xlu0 %v991_v56, %s1492_s15  ;;  %1076 = vrot.lane.b32.xlu2 %v1071_v58, %s1493_s16 }
 0x5f1   : > { %v1147_v59 = vpop.f32.mrf.mxu1 }
 0x5f2   : > { %v1151_v61 = vpack.c.bf16 %v1147_v59, %v1147_v59 }
 0x5f4   : > { %1154 = vrot.lane.b32.xlu0 %v1150_v60, %s1494_s17  ;;  %1156 = vrot.lane.b32.xlu1 %v1151_v61, %s1494_s17 }
 0x646   : > { %v1077_v7 = vpop.permute.xlu2 %1076 }
 0x64e   : > { %v995_v4 = vpop.permute.xlu1 %994 }
 0x64f   : > { %1001 = vst.msk [vmem:[#allocation2] sm:$0xf] %vm1000_vm11, %v995_v4 }
 0x656   : > { %v1075_v5 = vpop.permute.xlu0 %1074 }
 0x657   : > { %1081 = vst.msk [vmem:[#allocation2] sm:$0xf] %vm1080_vm12, %v1075_v5 }
 0x65e   : > { %v997_v6 = vpop.permute.xlu0 %996 }
 0x65f   : > { %1002 = vst.msk [vmem:[#allocation2 + $0x4] sm:$0xf] %vm1000_vm11, %v997_v6 }
 0x660   : > { %1082 = vst.msk [vmem:[#allocation2 + $0x4] sm:$0xf] %vm1080_vm12, %v1077_v7 }
 0x666   : > { %v1157_v8 = vpop.permute.xlu1 %1156  ;;  %v1155_v9 = vpop.permute.xlu0 %1154 }
 0x667   : > { %1162 = vst.msk [vmem:[#allocation2 + $0x4] sm:$0xf] %vm1160_vm13, %v1157_v8 }
 0x668   : > { %1161 = vst.msk [vmem:[#allocation2] sm:$0xf] %vm1160_vm13, %v1155_v9 }
 0x66f   : > { %v1398_v10 = vld [vmem:[#allocation2] sm:$0xff] }
 0x670   : > { %1379 = vmatmul.msk.bf16.vlgmr.msrb.gmra.mxu3 %vm448_vm0, %v1398_v10 }
 0x6f3   : > { %v1214_v11 = vpop.f32.mrf.mxu3 }
 0x6f4   : > { %v1219_v12 = vadd.f32 %v1581_v1, %v1214_v11 }
 0x6f6   : > { %v1221_v13 = vpack.c.bf16 %v1219_v12, %v1219_v12 }
 0x6f8   : > { %1224 = vst.msk [vmem:[%s440_s14] sm:$0xf] %vm1223_vm14, %v1221_v13 }
 0x6fb   : > { %v1216_v15 = vpop.f32.mrf.mxu3 }
 0x6fc   : > { %v1220_v16 = vadd.f32 %v1585_v3, %v1216_v15 }
 0x6fe   : > { %v1222_v17 = vpack.c.bf16 %v1220_v16, %v1220_v16 }
 0x700   : > { %1225 = vst.msk [vmem:[%s440_s14 + $0x4] sm:$0xf] %vm1223_vm14, %v1222_v17 }
 0x701 PF: > { %s23_s25 = sadd.s32 1, %s1484_s25  }
 0x702   : > { %p20_p4 = scmp.ge.s32.totalorder %s23_s25, 4  }
 0x704   :  { %22 = sbr.rel (!%p20_p4) target bundleno = 1 (0x1), region = 102 }

</bundles_post_ra>
